<compile_context>
chip_gen: v7x
topology: tpu7x:2x2x1
jax: 0.10.0
libtpu: 0.0.40
codegen_flags: <defaults>
</compile_context>

<pallas_src>
import jax
import jax.numpy as jnp
from jax.experimental import pallas as pl
from jax.experimental.pallas import tpu as pltpu

K1 = 896    # 784 padded up to a multiple of 128
H1 = 512
H2 = 256
NOUT = 128  # final-layer columns padded 1 -> 128 for a lane-dense output store


def _round_up(x, m):
    return (x + m - 1) // m * m


def _discriminator_kernel(x_ref, w1_ref, b1_ref, w2_ref, b2_ref, w3_ref, b3_ref, o_ref):
    """Fused 3-layer MLP on one (TB, K1) batch tile.

    bf16 MXU matmuls with f32 accumulation; bias / LeakyReLU / sigmoid in f32.
    """
    neg_slope = jnp.float32(0.01)  # PyTorch nn.LeakyReLU default

    x = x_ref[...]                                                      # (TB, 896) bf16

    h1 = jnp.dot(x, w1_ref[...], preferred_element_type=jnp.float32)   # (TB, 512) f32
    h1 = h1 + b1_ref[...]
    h1 = jnp.where(h1 > 0, h1, neg_slope * h1)

    h2 = jnp.dot(h1.astype(jnp.bfloat16), w2_ref[...],
                 preferred_element_type=jnp.float32)                    # (TB, 256) f32
    h2 = h2 + b2_ref[...]
    h2 = jnp.where(h2 > 0, h2, neg_slope * h2)

    h3 = jnp.dot(h2.astype(jnp.bfloat16), w3_ref[...],
                 preferred_element_type=jnp.float32)                    # (TB, 128) f32
    h3 = h3 + b3_ref[...]

    o_ref[...] = 1.0 / (1.0 + jnp.exp(-h3))   # sigmoid; only column 0 is meaningful


def discriminator_forward(x, params):
    """x: (B, 1, 28, 28) float32 (NCHW). Returns (B, 1) float32."""
    w1, b1, w2, b2, w3, b3 = params
    B = x.shape[0]

    # Flatten exactly like torch .view(-1, 784); zero-pad K 784 -> 896.
    x2d = x.reshape(B, 28 * 28)
    x2d = jnp.pad(x2d, ((0, 0), (0, K1 - 28 * 28)))

    # Batch tiling: TB rows per grid step; pad batch to a multiple of TB.
    TB = 512 if B >= 512 else _round_up(B, 8)
    B_pad = _round_up(B, TB)
    if B_pad != B:
        x2d = jnp.pad(x2d, ((0, B_pad - B), (0, 0)))
    x_bf16 = x2d.astype(jnp.bfloat16)

    # Weights: zero-pad + cast to bf16 (zeros contribute nothing). Biases stay f32.
    w1p = jnp.pad(w1, ((0, K1 - w1.shape[0]), (0, 0))).astype(jnp.bfloat16)    # (896, 512)
    w2p = w2.astype(jnp.bfloat16)                                              # (512, 256)
    w3p = jnp.pad(w3, ((0, 0), (0, NOUT - w3.shape[1]))).astype(jnp.bfloat16)  # (256, 128)
    b3p = jnp.pad(b3, ((0, 0), (0, NOUT - b3.shape[1])))                       # (1, 128)

    const = lambda shape: pl.BlockSpec(shape, lambda i: (0, 0))  # resident blocks

    out = pl.pallas_call(
        _discriminator_kernel,
        out_shape=jax.ShapeDtypeStruct((B_pad, NOUT), jnp.float32),
        grid=(B_pad // TB,),
        in_specs=[
            pl.BlockSpec((TB, K1), lambda i: (i, 0)),   # x tile (streamed, pipelined)
            const(w1p.shape),
            const(b1.shape),
            const(w2p.shape),
            const(b2.shape),
            const(w3p.shape),
            const(b3p.shape),
        ],
        out_specs=pl.BlockSpec((TB, NOUT), lambda i: (i, 0)),
        compiler_params=pltpu.CompilerParams(
            dimension_semantics=("parallel",),
            vmem_limit_bytes=32 << 20,
        ),
    )(x_bf16, w1p, b1, w2p, b2, w3p, b3p)

    return out[:B, :1]


def init_params(key):
    """Parameter shapes matching the PyTorch module (weights stored transposed:
    (in_features, out_features)) so the kernel computes x @ W directly."""
    k1, k2, k3, k4, k5, k6 = jax.random.split(key, 6)

    def lin(kw, kb, fan_in, fan_out):
        bound = 1.0 / jnp.sqrt(jnp.float32(fan_in))
        w = jax.random.uniform(kw, (fan_in, fan_out), jnp.float32, -bound, bound)
        b = jax.random.uniform(kb, (1, fan_out), jnp.float32, -bound, bound)
        return w, b

    w1, b1 = lin(k1, k2, 28 * 28, 512)
    w2, b2 = lin(k3, k4, 512, 256)
    w3, b3 = lin(k5, k6, 256, 1)
    return (w1, b1, w2, b2, w3, b3)


def _reference_forward_bf16(x, params):
    """Plain-JAX reference with the same bf16-input / f32-accumulate arithmetic."""
    w1, b1, w2, b2, w3, b3 = params
    h = x.reshape(x.shape[0], 28 * 28)
    h = jnp.dot(h.astype(jnp.bfloat16), w1.astype(jnp.bfloat16),
                preferred_element_type=jnp.float32) + b1
    h = jnp.where(h > 0, h, 0.01 * h)
    h = jnp.dot(h.astype(jnp.bfloat16), w2.astype(jnp.bfloat16),
                preferred_element_type=jnp.float32) + b2
    h = jnp.where(h > 0, h, 0.01 * h)
    h = jnp.dot(h.astype(jnp.bfloat16), w3.astype(jnp.bfloat16),
                preferred_element_type=jnp.float32) + b3
    return 1.0 / (1.0 + jnp.exp(-h))


def _reference_forward_f32(x, params):
    """Full-f32 reference (loose sanity check)."""
    w1, b1, w2, b2, w3, b3 = params
    h = x.reshape(x.shape[0], 28 * 28)
    h = h @ w1 + b1
    h = jnp.where(h > 0, h, 0.01 * h)
    h = h @ w2 + b2
    h = jnp.where(h > 0, h, 0.01 * h)
    h = h @ w3 + b3
    return jax.nn.sigmoid(h)


if __name__ == "__main__":
    key = jax.random.PRNGKey(0)
    kx, kp = jax.random.split(key)

    B = 8
    x = jax.random.normal(kx, (B, 1, 28, 28), dtype=jnp.float32)  # NCHW, like MNIST
    params = init_params(kp)

    out = jax.block_until_ready(discriminator_forward(x, params))

    ref_bf16 = _reference_forward_bf16(x, params)
    ref_f32 = _reference_forward_f32(x, params)

    assert out.shape == (B, 1), out.shape
    assert jnp.allclose(out, ref_bf16, atol=2e-3, rtol=2e-3), "mismatch vs bf16 reference"
    assert jnp.allclose(out, ref_f32, atol=5e-2, rtol=5e-2), "mismatch vs f32 reference"

    print("KERNEL_OK")
</pallas_src>

<mosaic_0001>
module attributes {stable_mosaic.version = 11 : i64} {
  func.func @_discriminator_kernel(%arg0: i32, %arg1: memref<8x896xbf16, #tpu.memory_space<vmem>>, %arg2: memref<896x512xbf16, #tpu.memory_space<vmem>>, %arg3: memref<1x512xf32, #tpu.memory_space<vmem>>, %arg4: memref<512x256xbf16, #tpu.memory_space<vmem>>, %arg5: memref<1x256xf32, #tpu.memory_space<vmem>>, %arg6: memref<256x128xbf16, #tpu.memory_space<vmem>>, %arg7: memref<1x128xf32, #tpu.memory_space<vmem>>, %arg8: memref<8x128xf32, #tpu.memory_space<vmem>>) attributes {dimension_semantics = [#tpu.dimension_semantics<parallel>], iteration_bounds = array<i64: 1>, scalar_prefetch = 0 : i64, scratch_operands = 0 : i64, tpu.core_type = #tpu.core_type<tc>, window_params = [{transform_indices = @transform_0, window_bounds = array<i64: 8, 896>}, {pipeline_mode = #tpu.pipeline_mode<synchronous>, transform_indices = @transform_1, window_bounds = array<i64: 896, 512>}, {pipeline_mode = #tpu.pipeline_mode<synchronous>, transform_indices = @transform_2, window_bounds = array<i64: 1, 512>}, {pipeline_mode = #tpu.pipeline_mode<synchronous>, transform_indices = @transform_3, window_bounds = array<i64: 512, 256>}, {pipeline_mode = #tpu.pipeline_mode<synchronous>, transform_indices = @transform_4, window_bounds = array<i64: 1, 256>}, {pipeline_mode = #tpu.pipeline_mode<synchronous>, transform_indices = @transform_5, window_bounds = array<i64: 256, 128>}, {pipeline_mode = #tpu.pipeline_mode<synchronous>, transform_indices = @transform_6, window_bounds = array<i64: 1, 128>}, {transform_indices = @transform_7, window_bounds = array<i64: 8, 128>}]} {
    %c0 = arith.constant 0 : index
    %c0_0 = arith.constant 0 : index
    %0 = vector.load %arg1[%c0, %c0_0] : memref<8x896xbf16, #tpu.memory_space<vmem>>, vector<8x896xbf16>
    %c0_1 = arith.constant 0 : index
    %c0_2 = arith.constant 0 : index
    %1 = vector.load %arg2[%c0_1, %c0_2] : memref<896x512xbf16, #tpu.memory_space<vmem>>, vector<896x512xbf16>
    %cst = arith.constant dense<0.000000e+00> : vector<8x512xf32>
    %2 = tpu.matmul %0, %1, %cst {dimension_numbers = #tpu.dot_dimension_numbers<[1], [0], [0], [1], [0, 0, 1, 1], [], []>} : vector<8x896xbf16>, vector<896x512xbf16>, vector<8x512xf32> -> vector<8x512xf32>
    %c0_3 = arith.constant 0 : index
    %c0_4 = arith.constant 0 : index
    %3 = vector.load %arg3[%c0_3, %c0_4] : memref<1x512xf32, #tpu.memory_space<vmem>>, vector<1x512xf32>
    %4 = vector.broadcast %3 : vector<1x512xf32> to vector<8x512xf32>
    %5 = arith.addf %2, %4 : vector<8x512xf32>
    %cst_5 = arith.constant 0.000000e+00 : f32
    %6 = vector.broadcast %cst_5 : f32 to vector<8x512xf32>
    %7 = arith.cmpf ogt, %5, %6 : vector<8x512xf32>
    %cst_6 = arith.constant 0.00999999977 : f32
    %8 = vector.broadcast %cst_6 : f32 to vector<8x512xf32>
    %9 = arith.mulf %8, %5 : vector<8x512xf32>
    %10 = arith.select %7, %5, %9 : vector<8x512xi1>, vector<8x512xf32>
    %11 = arith.truncf %10 : vector<8x512xf32> to vector<8x512xbf16>
    %c0_7 = arith.constant 0 : index
    %c0_8 = arith.constant 0 : index
    %12 = vector.load %arg4[%c0_7, %c0_8] : memref<512x256xbf16, #tpu.memory_space<vmem>>, vector<512x256xbf16>
    %cst_9 = arith.constant dense<0.000000e+00> : vector<8x256xf32>
    %13 = tpu.matmul %11, %12, %cst_9 {dimension_numbers = #tpu.dot_dimension_numbers<[1], [0], [0], [1], [0, 0, 1, 1], [], []>} : vector<8x512xbf16>, vector<512x256xbf16>, vector<8x256xf32> -> vector<8x256xf32>
    %c0_10 = arith.constant 0 : index
    %c0_11 = arith.constant 0 : index
    %14 = vector.load %arg5[%c0_10, %c0_11] : memref<1x256xf32, #tpu.memory_space<vmem>>, vector<1x256xf32>
    %15 = vector.broadcast %14 : vector<1x256xf32> to vector<8x256xf32>
    %16 = arith.addf %13, %15 : vector<8x256xf32>
    %cst_12 = arith.constant 0.000000e+00 : f32
    %17 = vector.broadcast %cst_12 : f32 to vector<8x256xf32>
    %18 = arith.cmpf ogt, %16, %17 : vector<8x256xf32>
    %cst_13 = arith.constant 0.00999999977 : f32
    %19 = vector.broadcast %cst_13 : f32 to vector<8x256xf32>
    %20 = arith.mulf %19, %16 : vector<8x256xf32>
    %21 = arith.select %18, %16, %20 : vector<8x256xi1>, vector<8x256xf32>
    %22 = arith.truncf %21 : vector<8x256xf32> to vector<8x256xbf16>
    %c0_14 = arith.constant 0 : index
    %c0_15 = arith.constant 0 : index
    %23 = vector.load %arg6[%c0_14, %c0_15] : memref<256x128xbf16, #tpu.memory_space<vmem>>, vector<256x128xbf16>
    %cst_16 = arith.constant dense<0.000000e+00> : vector<8x128xf32>
    %24 = tpu.matmul %22, %23, %cst_16 {dimension_numbers = #tpu.dot_dimension_numbers<[1], [0], [0], [1], [0, 0, 1, 1], [], []>} : vector<8x256xbf16>, vector<256x128xbf16>, vector<8x128xf32> -> vector<8x128xf32>
    %c0_17 = arith.constant 0 : index
    %c0_18 = arith.constant 0 : index
    %25 = vector.load %arg7[%c0_17, %c0_18] : memref<1x128xf32, #tpu.memory_space<vmem>>, vector<1x128xf32>
    %26 = vector.broadcast %25 : vector<1x128xf32> to vector<8x128xf32>
    %27 = arith.addf %24, %26 : vector<8x128xf32>
    %cst_19 = arith.constant 0.000000e+00 : f32
    %28 = vector.broadcast %cst_19 : f32 to vector<8x128xf32>
    %29 = arith.subf %28, %27 : vector<8x128xf32>
    %30 = math.exp %29 : vector<8x128xf32>
    %cst_20 = arith.constant 1.000000e+00 : f32
    %31 = vector.broadcast %cst_20 : f32 to vector<8x128xf32>
    %32 = arith.addf %31, %30 : vector<8x128xf32>
    %cst_21 = arith.constant 1.000000e+00 : f32
    %33 = vector.broadcast %cst_21 : f32 to vector<8x128xf32>
    %34 = arith.divf %33, %32 : vector<8x128xf32>
    %c0_22 = arith.constant 0 : index
    %c0_23 = arith.constant 0 : index
    %35 = vector.load %arg8[%c0_22, %c0_23] : memref<8x128xf32, #tpu.memory_space<vmem>>, vector<8x128xf32>
    tpu.vector_store %arg8[%c0_22, %c0_23], %34 {strides = array<i32>} : memref<8x128xf32, #tpu.memory_space<vmem>>, vector<8x128xf32>,
    return
  }
  func.func @transform_0(%arg0: i32) -> (i32, i32) {
    %c0_i32 = arith.constant 0 : i32
    %c0_i32_0 = arith.constant 0 : i32
    return %arg0, %c0_i32 : i32, i32
  }
  func.func @transform_1(%arg0: i32) -> (i32, i32) {
    %c0_i32 = arith.constant 0 : i32
    %c0_i32_0 = arith.constant 0 : i32
    %c0_i32_1 = arith.constant 0 : i32
    return %c0_i32, %c0_i32_0 : i32, i32
  }
  func.func @transform_2(%arg0: i32) -> (i32, i32) {
    %c0_i32 = arith.constant 0 : i32
    %c0_i32_0 = arith.constant 0 : i32
    %c0_i32_1 = arith.constant 0 : i32
    return %c0_i32, %c0_i32_0 : i32, i32
  }
  func.func @transform_3(%arg0: i32) -> (i32, i32) {
    %c0_i32 = arith.constant 0 : i32
    %c0_i32_0 = arith.constant 0 : i32
    %c0_i32_1 = arith.constant 0 : i32
    return %c0_i32, %c0_i32_0 : i32, i32
  }
  func.func @transform_4(%arg0: i32) -> (i32, i32) {
    %c0_i32 = arith.constant 0 : i32
    %c0_i32_0 = arith.constant 0 : i32
    %c0_i32_1 = arith.constant 0 : i32
    return %c0_i32, %c0_i32_0 : i32, i32
  }
  func.func @transform_5(%arg0: i32) -> (i32, i32) {
    %c0_i32 = arith.constant 0 : i32
    %c0_i32_0 = arith.constant 0 : i32
    %c0_i32_1 = arith.constant 0 : i32
    return %c0_i32, %c0_i32_0 : i32, i32
  }
  func.func @transform_6(%arg0: i32) -> (i32, i32) {
    %c0_i32 = arith.constant 0 : i32
    %c0_i32_0 = arith.constant 0 : i32
    %c0_i32_1 = arith.constant 0 : i32
    return %c0_i32, %c0_i32_0 : i32, i32
  }
  func.func @transform_7(%arg0: i32) -> (i32, i32) {
    %c0_i32 = arith.constant 0 : i32
    %c0_i32_0 = arith.constant 0 : i32
    return %arg0, %c0_i32 : i32, i32
  }
}

</mosaic_0001>

<bundles_post_ra>
// kernel: tpu_custom_call.1
= control target key start
LH: loop header
LB: loop body
LE: loop exit
PB: predicated region body
PF: predicated region fallthrough
CT: control target
= control target key end

     0   :  { %12 = vsyncpa [#allocation3], 0  ;;  %s3637_s0 = inlined_call_operand.hbm [shape: bf16[8,896], index: 0, kind: input, shape index: {}]   ;;  %s3638_s1 = inlined_call_operand.hbm [shape: bf16[896,512], index: 1, kind: input, shape index: {}]   ;;  %s3639_s2 = inlined_call_operand.vmem [shape: f32[1,512], index: 2, kind: input, shape index: {}]   ;;  %s3640_s3 = inlined_call_operand.hbm [shape: bf16[512,256], index: 3, kind: input, shape index: {}]   ;;  %s3641_s4 = inlined_call_operand.vmem [shape: f32[1,256], index: 4, kind: input, shape index: {}]   ;;  %s3642_s5 = inlined_call_operand.hbm [shape: bf16[256,128], index: 5, kind: input, shape index: {}]   ;;  %s3643_s6 = inlined_call_operand.vmem [shape: f32[1,128], index: 6, kind: input, shape index: {}]   ;;  %s3644_s7 = inlined_call_operand.hbm [shape: f32[8,128], index: 7, kind: output, shape index: {}]  }
   0x1   :  { %13 = vsyncpa [#allocation6], 0 }
   0x2   :  { %14 = vsyncpa [#allocation9], 0 }
   0x3   :  { %15 = vsyncpa [#allocation4], 0  ;;  %s3460_s24 = smov [#allocation5]   ;;  %s3342_s28 = scalar_lea.hbm %s3638_s1, 28672 }
   0x4   :  { %s31_s25 = sshll.u32 %s3460_s24, 4  ;;  %p3343_p0 = scmp.ne.s32.totalorder %s3638_s1, %s3342_s28  ;;  %s32_s25 = int_to_ptr.vmem [resolvable:$true] %s31_s25 }
   0x5   :  { %p3346_p1 = scmp.lt.u32.totalorder %s3342_s28, %s3638_s1 }
   0x7   :  { %p3348_p2 = pnand %p3346_p1, %p3343_p0 }
   0x9   :  { %3351 = shalt.err (!%p3348_p2)
}
   0xa   :  { %s3352_s10 = scalar_lea.vmem %s32_s25, 28672  ;;  %p3357_p4 = scmp.lt.s32.totalorder %s32_s25, %s32_s25 }
   0xb   :  { %p3353_p3 = scmp.ne.s32.totalorder %s32_s25, %s3352_s10  ;;  %p3358_p5 = scmp.lt.s32.totalorder %s3352_s10, %s3352_s10 }
   0xd   :  { %p3359_p6 = por %p3358_p5, %p3357_p4 }
   0xf   :  { %p3360_p7 = pnand %p3359_p6, %p3353_p3 }
  0x11   :  { %3363 = shalt.err (!%p3360_p7)
}
  0x12   :  { %s3461_s11 = smov 256   ;;  %s3462_s12 = smov 16  }
  0x13   :  { %37 = dma.hbm_to_vmem [thread:$0]  %s3638_s1, 28672, %s32_s25, [#allocation6], %s3461_s11, %s3461_s11, %s3462_s12  }
  0x14   :  { %s3463_s15 = smov [#allocation2]   ;;  %s3464_s17 = smov [#allocation7]  }
  0x15   :  { %s22_s16 = sshll.u32 %s3463_s15, 4  ;;  %s45_s18 = sshll.u32 %s3464_s17, 4  ;;  %s23_s16 = int_to_ptr.vmem [resolvable:$true] %s22_s16  ;;  %s46_s18 = int_to_ptr.vmem [resolvable:$true] %s45_s18 }
  0x16   :  { %s3364_s21 = scalar_lea.hbm %s3637_s0, 448 }
  0x17   :  { %p3365_p8 = scmp.ne.s32.totalorder %s3637_s0, %s3364_s21  ;;  %p3368_p9 = scmp.lt.u32.totalorder %s3364_s21, %s3637_s0 }
  0x19   :  { %p3370_p10 = pnand %p3368_p9, %p3365_p8 }
  0x1b   :  { %3373 = shalt.err (!%p3370_p10)
}
  0x1c   :  { %s3374_s1 = scalar_lea.vmem %s23_s16, 448  ;;  %p3379_p12 = scmp.lt.s32.totalorder %s23_s16, %s23_s16 }
  0x1d   :  { %p3375_p11 = scmp.ne.s32.totalorder %s23_s16, %s3374_s1  ;;  %p3380_p13 = scmp.lt.s32.totalorder %s3374_s1, %s3374_s1 }
  0x1f   :  { %p3381_p0 = por %p3380_p13, %p3379_p12 }
  0x21   :  { %p3382_p1 = pnand %p3381_p0, %p3375_p11 }
  0x23   :  { %3385 = shalt.err (!%p3382_p1)
}
  0x24   :  { %25 = dma.hbm_to_vmem [thread:$0]  %s3637_s0, 448, %s23_s16, [#allocation3]  }
  0x25   :  { %s3386_s30 = scalar_lea.hbm %s3640_s3, 8192 }
  0x26   :  { %p3387_p2 = scmp.ne.s32.totalorder %s3640_s3, %s3386_s30  ;;  %p3390_p3 = scmp.lt.u32.totalorder %s3386_s30, %s3640_s3 }
  0x28   :  { %p3392_p4 = pnand %p3390_p3, %p3387_p2 }
  0x2a   :  { %3395 = shalt.err (!%p3392_p4)
}
  0x2b   :  { %s3396_s12 = scalar_lea.vmem %s46_s18, 8192  ;;  %p3401_p6 = scmp.lt.s32.totalorder %s46_s18, %s46_s18 }
  0x2c   :  { %p3397_p5 = scmp.ne.s32.totalorder %s46_s18, %s3396_s12  ;;  %p3402_p7 = scmp.lt.s32.totalorder %s3396_s12, %s3396_s12 }
  0x2e   :  { %p3403_p8 = por %p3402_p7, %p3401_p6 }
  0x30   :  { %p3404_p9 = pnand %p3403_p8, %p3397_p5 }
  0x32   :  { %3407 = shalt.err (!%p3404_p9)
}
  0x33   :  { %s3465_s0 = smov 128   ;;  %s3466_s13 = smov 8  }
  0x34   :  { %51 = dma.hbm_to_vmem [thread:$0]  %s3640_s3, 8192, %s46_s18, [#allocation6], %s3465_s0, %s3465_s0, %s3466_s13  }
  0x35   :  { %s3467_s16 = smov [#allocation8]   ;;  %s3408_s21 = scalar_lea.hbm %s3642_s5, 2048 }
  0x36   :  { %s59_s17 = sshll.u32 %s3467_s16, 4  ;;  %p3409_p10 = scmp.ne.s32.totalorder %s3642_s5, %s3408_s21  ;;  %s60_s17 = int_to_ptr.vmem [resolvable:$true] %s59_s17 }
  0x37   :  { %p3412_p11 = scmp.lt.u32.totalorder %s3408_s21, %s3642_s5 }
  0x39   :  { %p3414_p12 = pnand %p3412_p11, %p3409_p10 }
  0x3b   :  { %3417 = shalt.err (!%p3414_p12)
}
  0x3c   :  { %s3418_s1 = scalar_lea.vmem %s60_s17, 2048  ;;  %p3423_p0 = scmp.lt.s32.totalorder %s60_s17, %s60_s17 }
  0x3d   :  { %p3419_p13 = scmp.ne.s32.totalorder %s60_s17, %s3418_s1  ;;  %p3424_p1 = scmp.lt.s32.totalorder %s3418_s1, %s3418_s1 }
  0x3f   :  { %p3425_p2 = por %p3424_p1, %p3423_p0 }
  0x41   :  { %p3426_p3 = pnand %p3425_p2, %p3419_p13 }
  0x43   :  { %3429 = shalt.err (!%p3426_p3)
}
  0x44   :  { %s3468_s3 = smov 64   ;;  %s3469_s18 = smov 4  }
  0x45   :  { %65 = dma.hbm_to_vmem [thread:$0]  %s3642_s5, 2048, %s60_s17, [#allocation9], %s3468_s3, %s3468_s3, %s3469_s18  }
  0x46   :  { %3452 = dma.done.wait [#allocation3], 448  }
  0x47   :  { %3453 = vsyncadd [#allocation3], 4294966848 }
  0x48   :  { %3454 = dma.done.wait [#allocation6], 36864  }
  0x49   :  { %3455 = vsyncadd [#allocation6], 4294930432 }
  0x4a   :  { %3456 = dma.done.wait [#allocation9], 2048  }
  0x4b   :  { %3457 = vsyncadd [#allocation9], 4294965248  ;;  %v2883_v0 = vld [vmem:[#allocation5 + $0x4] ss:$16 sps:$4 sm:$0xff]   ;;  %v2887_v2 = vld [vmem:[#allocation5] ss:$16 sps:$4 sm:$0xff]  }
  0x4c   :  { %v2885_v1 = vld [vmem:[#allocation5 + $0x204] ss:$16 sps:$4 sm:$0xff]   ;;  %1476 = vmatprep.subr.bf16.mxu1 %v2883_v0  ;;  %v2888_v3 = vld [vmem:[#allocation5 + $0x200] ss:$16 sps:$4 sm:$0xff]   ;;  %s3471_s8 = smov [#allocation10]  }
  0x4d   :  { %1517 = vmatprep.subr.bf16.mxu0 %v2885_v1  ;;  %v2889_v4 = vld [vmem:[#allocation5 + $0x24] ss:$16 sps:$4 sm:$0xff]   ;;  %1477 = vmatpush1.bf16.msra.mxu1 %v2887_v2  ;;  %v2893_v6 = vld [vmem:[#allocation5 + $0x20] ss:$16 sps:$4 sm:$0xff]   ;;  %s2494_s9 = sshll.u32 %s3471_s8, 4  ;;  %s2495_s9 = int_to_ptr.vmem [resolvable:$true] %s2494_s9 }
  0x4e   :  { %1518 = vmatpush1.bf16.msra.mxu0 %v2888_v3  ;;  %v2891_v5 = vld [vmem:[#allocation5 + $0x224] ss:$16 sps:$4 sm:$0xff]   ;;  %1478 = vmatprep.subr.bf16.mxu1 %v2889_v4  ;;  %v2894_v7 = vld [vmem:[#allocation5 + $0x220] ss:$16 sps:$4 sm:$0xff]   ;;  %s3430_s10 = scalar_lea.vmem %s2495_s9, 128  ;;  %p3435_p5 = scmp.lt.s32.totalorder %s2495_s9, %s2495_s9 }
  0x4f   :  { %1519 = vmatprep.subr.bf16.mxu0 %v2891_v5  ;;  %v2895_v8 = vld [vmem:[#allocation5 + $0x44] ss:$16 sps:$4 sm:$0xff]   ;;  %v2899_v10 = vld [vmem:[#allocation5 + $0x40] ss:$16 sps:$4 sm:$0xff]   ;;  %v2988_v5 = vld [vmem:[#allocation5 + $0xc] ss:$16 sps:$4 sm:$0xff]   ;;  %p3431_p4 = scmp.ne.s32.totalorder %s2495_s9, %s3430_s10  ;;  %p3436_p6 = scmp.lt.s32.totalorder %s3430_s10, %s3430_s10 }
  0x50   :  { %v2897_v9 = vld [vmem:[#allocation5 + $0x244] ss:$16 sps:$4 sm:$0xff]   ;;  %v2900_v11 = vld [vmem:[#allocation5 + $0x240] ss:$16 sps:$4 sm:$0xff]  }
  0x51   :  { %1479 = vmatpush1.bf16.msra.mxu1 %v2893_v6  ;;  %v2901_v12 = vld [vmem:[#allocation5 + $0x64] ss:$16 sps:$4 sm:$0xff]   ;;  %v2905_v14 = vld [vmem:[#allocation5 + $0x60] ss:$16 sps:$4 sm:$0xff]   ;;  %p3437_p7 = por %p3436_p6, %p3435_p5 }
  0x52   :  { %1520 = vmatpush1.bf16.msra.mxu0 %v2894_v7  ;;  %1480 = vmatprep.subr.bf16.mxu1 %v2895_v8  ;;  %v2903_v13 = vld [vmem:[#allocation5 + $0x264] ss:$16 sps:$4 sm:$0xff]   ;;  %v2906_v15 = vld [vmem:[#allocation5 + $0x260] ss:$16 sps:$4 sm:$0xff]  }
  0x53   :  { %1521 = vmatprep.subr.bf16.mxu0 %v2897_v9  ;;  %v2907_v16 = vld [vmem:[#allocation5 + $0x84] ss:$16 sps:$4 sm:$0xff]   ;;  %v2911_v18 = vld [vmem:[#allocation5 + $0x80] ss:$16 sps:$4 sm:$0xff]   ;;  %v2986_v9 = vld [vmem:[#allocation5 + $0x8] ss:$16 sps:$4 sm:$0xff]   ;;  %p3438_p8 = pnand %p3437_p7, %p3431_p4 }
  0x54   :  { %v2909_v17 = vld [vmem:[#allocation5 + $0x284] ss:$16 sps:$4 sm:$0xff]   ;;  %v2912_v19 = vld [vmem:[#allocation5 + $0x280] ss:$16 sps:$4 sm:$0xff]  }
  0x55   :  { %1481 = vmatpush1.bf16.msra.mxu1 %v2899_v10  ;;  %v2913_v20 = vld [vmem:[#allocation5 + $0xa4] ss:$16 sps:$4 sm:$0xff]   ;;  %v2917_v22 = vld [vmem:[#allocation5 + $0xa0] ss:$16 sps:$4 sm:$0xff]  }
  0x56   :  { %1522 = vmatpush1.bf16.msra.mxu0 %v2900_v11  ;;  %1482 = vmatprep.subr.bf16.mxu1 %v2901_v12  ;;  %v2915_v21 = vld [vmem:[#allocation5 + $0x2a4] ss:$16 sps:$4 sm:$0xff]   ;;  %v2918_v23 = vld [vmem:[#allocation5 + $0x2a0] ss:$16 sps:$4 sm:$0xff]   ;;  %v2994_v11 = vld [vmem:[#allocation5 + $0x2c] ss:$16 sps:$4 sm:$0xff]  }
  0x57   :  { %1523 = vmatprep.subr.bf16.mxu0 %v2903_v13  ;;  %v2919_v24 = vld [vmem:[#allocation5 + $0xc4] ss:$16 sps:$4 sm:$0xff]   ;;  %v2923_v26 = vld [vmem:[#allocation5 + $0xc0] ss:$16 sps:$4 sm:$0xff]   ;;  %v2992_v13 = vld [vmem:[#allocation5 + $0x28] ss:$16 sps:$4 sm:$0xff]  }
  0x58   :  { %v2921_v25 = vld [vmem:[#allocation5 + $0x2c4] ss:$16 sps:$4 sm:$0xff]   ;;  %v2924_v27 = vld [vmem:[#allocation5 + $0x2c0] ss:$16 sps:$4 sm:$0xff]  }
  0x59   :  { %1483 = vmatpush1.bf16.msra.mxu1 %v2905_v14  ;;  %v2925_v28 = vld [vmem:[#allocation5 + $0xe4] ss:$16 sps:$4 sm:$0xff]   ;;  %v2929_v30 = vld [vmem:[#allocation5 + $0xe0] ss:$16 sps:$4 sm:$0xff]  }
  0x5a   :  { %1524 = vmatpush1.bf16.msra.mxu0 %v2906_v15  ;;  %1484 = vmatprep.subr.bf16.mxu1 %v2907_v16  ;;  %v2927_v29 = vld [vmem:[#allocation5 + $0x2e4] ss:$16 sps:$4 sm:$0xff]   ;;  %v2930_v31 = vld [vmem:[#allocation5 + $0x2e0] ss:$16 sps:$4 sm:$0xff]   ;;  %v3000_v15 = vld [vmem:[#allocation5 + $0x4c] ss:$16 sps:$4 sm:$0xff]  }
  0x5b   :  { %1525 = vmatprep.subr.bf16.mxu0 %v2909_v17  ;;  %v2931_v32 = vld [vmem:[#allocation5 + $0x104] ss:$16 sps:$4 sm:$0xff]   ;;  %v2935_v34 = vld [vmem:[#allocation5 + $0x100] ss:$16 sps:$4 sm:$0xff]   ;;  %v2998_v17 = vld [vmem:[#allocation5 + $0x48] ss:$16 sps:$4 sm:$0xff]  }
  0x5c   :  { %v2933_v33 = vld [vmem:[#allocation5 + $0x304] ss:$16 sps:$4 sm:$0xff]   ;;  %v2936_v35 = vld [vmem:[#allocation5 + $0x300] ss:$16 sps:$4 sm:$0xff]  }
  0x5d   :  { %1485 = vmatpush1.bf16.msra.mxu1 %v2911_v18  ;;  %v2937_v36 = vld [vmem:[#allocation5 + $0x124] ss:$16 sps:$4 sm:$0xff]   ;;  %v2941_v38 = vld [vmem:[#allocation5 + $0x120] ss:$16 sps:$4 sm:$0xff]  }
  0x5e   :  { %1526 = vmatpush1.bf16.msra.mxu0 %v2912_v19  ;;  %1486 = vmatprep.subr.bf16.mxu1 %v2913_v20  ;;  %v2939_v37 = vld [vmem:[#allocation5 + $0x324] ss:$16 sps:$4 sm:$0xff]   ;;  %v2942_v39 = vld [vmem:[#allocation5 + $0x320] ss:$16 sps:$4 sm:$0xff]   ;;  %v3006_v19 = vld [vmem:[#allocation5 + $0x6c] ss:$16 sps:$4 sm:$0xff]  }
  0x5f   :  { %1527 = vmatprep.subr.bf16.mxu0 %v2915_v21  ;;  %v2943_v40 = vld [vmem:[#allocation5 + $0x144] ss:$16 sps:$4 sm:$0xff]   ;;  %v2947_v42 = vld [vmem:[#allocation5 + $0x140] ss:$16 sps:$4 sm:$0xff]   ;;  %v3004_v21 = vld [vmem:[#allocation5 + $0x68] ss:$16 sps:$4 sm:$0xff]  }
  0x60   :  { %v2945_v41 = vld [vmem:[#allocation5 + $0x344] ss:$16 sps:$4 sm:$0xff]   ;;  %v2948_v43 = vld [vmem:[#allocation5 + $0x340] ss:$16 sps:$4 sm:$0xff]  }
  0x61   :  { %1487 = vmatpush1.bf16.msra.mxu1 %v2917_v22  ;;  %v2949_v44 = vld [vmem:[#allocation5 + $0x164] ss:$16 sps:$4 sm:$0xff]   ;;  %v82_v48 = vld [vmem:[#allocation2 + $0x8] sm:$0xff] }
  0x62   :  { %1528 = vmatpush1.bf16.msra.mxu0 %v2918_v23  ;;  %1488 = vmatprep.subr.bf16.mxu1 %v2919_v24  ;;  %v2951_v45 = vld [vmem:[#allocation5 + $0x364] ss:$16 sps:$4 sm:$0xff]   ;;  %v2953_v49 = vld [vmem:[#allocation5 + $0x160] ss:$16 sps:$4 sm:$0xff]   ;;  %v3562_v51 = vcombine.high %v82_v48, %v82_v48  ;;  %v3568_v7 = vcombine.low %v82_v48, %v82_v48  ;;  %v3012_v23 = vld [vmem:[#allocation5 + $0x8c] ss:$16 sps:$4 sm:$0xff]  }
  0x63   :  { %1529 = vmatprep.subr.bf16.mxu0 %v2921_v25  ;;  %v81_v46 = vld [vmem:[#allocation2] sm:$0xff]  ;;  %v2954_v50 = vld [vmem:[#allocation5 + $0x360] ss:$16 sps:$4 sm:$0xff]  }
  0x64   :  { %v3560_v47 = vcombine.high %v81_v46, %v81_v46  ;;  %v2955_v52 = vld [vmem:[#allocation5 + $0x184] ss:$16 sps:$4 sm:$0xff]   ;;  %1549 = vmatprep.mubr.bf16.mxu0 %v3562_v51  ;;  %v2959_v54 = vld [vmem:[#allocation5 + $0x180] ss:$16 sps:$4 sm:$0xff]   ;;  %v3566_v6 = vcombine.low %v81_v46, %v81_v46  ;;  %v3010_v25 = vld [vmem:[#allocation5 + $0x88] ss:$16 sps:$4 sm:$0xff]  }
  0x65   :  { %1489 = vmatpush1.bf16.msra.mxu1 %v2923_v26  ;;  %v2957_v53 = vld [vmem:[#allocation5 + $0x384] ss:$16 sps:$4 sm:$0xff]   ;;  %v2960_v55 = vld [vmem:[#allocation5 + $0x380] ss:$16 sps:$4 sm:$0xff]  }
  0x66   :  { %1530 = vmatpush1.bf16.msra.mxu0 %v2924_v27  ;;  %1490 = vmatprep.subr.bf16.mxu1 %v2925_v28  ;;  %v2961_v56 = vld [vmem:[#allocation5 + $0x1a4] ss:$16 sps:$4 sm:$0xff]   ;;  %v2965_v58 = vld [vmem:[#allocation5 + $0x1a0] ss:$16 sps:$4 sm:$0xff]   ;;  %v3018_v27 = vld [vmem:[#allocation5 + $0xac] ss:$16 sps:$4 sm:$0xff]  }
  0x67   :  { %1531 = vmatprep.subr.bf16.mxu0 %v2927_v29  ;;  %1508 = vmatprep.mubr.bf16.mxu1 %v3560_v47  ;;  %v2963_v57 = vld [vmem:[#allocation5 + $0x3a4] ss:$16 sps:$4 sm:$0xff]   ;;  %v2966_v59 = vld [vmem:[#allocation5 + $0x3a0] ss:$16 sps:$4 sm:$0xff]   ;;  %v3016_v29 = vld [vmem:[#allocation5 + $0xa8] ss:$16 sps:$4 sm:$0xff]  }
  0x68   :  { %v2967_v60 = vld [vmem:[#allocation5 + $0x1c4] ss:$16 sps:$4 sm:$0xff]   ;;  %v2971_v62 = vld [vmem:[#allocation5 + $0x1c0] ss:$16 sps:$4 sm:$0xff]  }
  0x69   :  { %1491 = vmatpush1.bf16.msra.mxu1 %v2929_v30  ;;  %v2969_v61 = vld [vmem:[#allocation5 + $0x3c4] ss:$16 sps:$4 sm:$0xff]   ;;  %v2972_v63 = vld [vmem:[#allocation5 + $0x3c0] ss:$16 sps:$4 sm:$0xff]  }
  0x6a   :  { %1532 = vmatpush1.bf16.msra.mxu0 %v2930_v31  ;;  %1492 = vmatprep.subr.bf16.mxu1 %v2931_v32  ;;  %v2973_v0 = vld [vmem:[#allocation5 + $0x1e4] ss:$16 sps:$4 sm:$0xff]   ;;  %v2977_v2 = vld [vmem:[#allocation5 + $0x1e0] ss:$16 sps:$4 sm:$0xff]   ;;  %v3024_v31 = vld [vmem:[#allocation5 + $0xcc] ss:$16 sps:$4 sm:$0xff]  }
  0x6b   :  { %1533 = vmatprep.subr.bf16.mxu0 %v2933_v33  ;;  %v2975_v1 = vld [vmem:[#allocation5 + $0x3e4] ss:$16 sps:$4 sm:$0xff]   ;;  %v2978_v3 = vld [vmem:[#allocation5 + $0x3e0] ss:$16 sps:$4 sm:$0xff]  }
  0x6c   :  { %v2985_v4 = vld [vmem:[#allocation5 + $0x404] ss:$16 sps:$4 sm:$0xff]   ;;  %v2983_v8 = vld [vmem:[#allocation5 + $0x400] ss:$16 sps:$4 sm:$0xff]  }
  0x6d   :  { %1493 = vmatpush1.bf16.msra.mxu1 %v2935_v34  ;;  %v2991_v10 = vld [vmem:[#allocation5 + $0x424] ss:$16 sps:$4 sm:$0xff]   ;;  %v2989_v12 = vld [vmem:[#allocation5 + $0x420] ss:$16 sps:$4 sm:$0xff]  }
  0x6e   :  { %1534 = vmatpush1.bf16.msra.mxu0 %v2936_v35  ;;  %1494 = vmatprep.subr.bf16.mxu1 %v2937_v36  ;;  %v2997_v14 = vld [vmem:[#allocation5 + $0x444] ss:$16 sps:$4 sm:$0xff]   ;;  %v2995_v16 = vld [vmem:[#allocation5 + $0x440] ss:$16 sps:$4 sm:$0xff]   ;;  %v3022_v35 = vld [vmem:[#allocation5 + $0xc8] ss:$16 sps:$4 sm:$0xff]  }
  0x6f   :  { %1535 = vmatprep.subr.bf16.mxu0 %v2939_v37  ;;  %v3003_v18 = vld [vmem:[#allocation5 + $0x464] ss:$16 sps:$4 sm:$0xff]   ;;  %v3001_v20 = vld [vmem:[#allocation5 + $0x460] ss:$16 sps:$4 sm:$0xff]   ;;  %v3030_v37 = vld [vmem:[#allocation5 + $0xec] ss:$16 sps:$4 sm:$0xff]  }
  0x70   :  { %v3009_v22 = vld [vmem:[#allocation5 + $0x484] ss:$16 sps:$4 sm:$0xff]   ;;  %v3007_v24 = vld [vmem:[#allocation5 + $0x480] ss:$16 sps:$4 sm:$0xff]  }
  0x71   :  { %1495 = vmatpush1.bf16.msra.mxu1 %v2941_v38  ;;  %v3015_v26 = vld [vmem:[#allocation5 + $0x4a4] ss:$16 sps:$4 sm:$0xff]   ;;  %v3013_v28 = vld [vmem:[#allocation5 + $0x4a0] ss:$16 sps:$4 sm:$0xff]  }
  0x72   :  { %1536 = vmatpush1.bf16.msra.mxu0 %v2942_v39  ;;  %1496 = vmatprep.subr.bf16.mxu1 %v2943_v40  ;;  %v3021_v30 = vld [vmem:[#allocation5 + $0x4c4] ss:$16 sps:$4 sm:$0xff]   ;;  %v3019_v33 = vld [vmem:[#allocation5 + $0x4c0] ss:$16 sps:$4 sm:$0xff]   ;;  %v3028_v39 = vld [vmem:[#allocation5 + $0xe8] ss:$16 sps:$4 sm:$0xff]  }
  0x73   :  { %1537 = vmatprep.subr.bf16.mxu0 %v2945_v41  ;;  %v3573_v32 = vld [vmem:[#allocation2 + $0x10] sm:$0xff]  ;;  %v3025_v38 = vld [vmem:[#allocation5 + $0x4e0] ss:$16 sps:$4 sm:$0xff]   ;;  %v3036_v41 = vld [vmem:[#allocation5 + $0x10c] ss:$16 sps:$4 sm:$0xff]  }
  0x74   :  { %v3577_v34 = vcombine.high %v3573_v32, %v3573_v32  ;;  %v3027_v36 = vld [vmem:[#allocation5 + $0x4e4] ss:$16 sps:$4 sm:$0xff]   ;;  %v3037_v46 = vld [vmem:[#allocation5 + $0x520] ss:$16 sps:$4 sm:$0xff]  }
  0x75   :  { %1497 = vmatpush1.bf16.msra.mxu1 %v2947_v42  ;;  %v3033_v40 = vld [vmem:[#allocation5 + $0x504] ss:$16 sps:$4 sm:$0xff]   ;;  %v3031_v42 = vld [vmem:[#allocation5 + $0x500] ss:$16 sps:$4 sm:$0xff]  }
  0x76   :  { %1538 = vmatpush1.bf16.msra.mxu0 %v2948_v43  ;;  %1498 = vmatprep.subr.bf16.mxu1 %v2949_v44  ;;  %v3034_v43 = vld [vmem:[#allocation5 + $0x108] ss:$16 sps:$4 sm:$0xff]   ;;  %v3039_v44 = vld [vmem:[#allocation5 + $0x524] ss:$16 sps:$4 sm:$0xff]  }
  0x77   :  { %1539 = vmatprep.subr.bf16.mxu0 %v2951_v45  ;;  %v3042_v45 = vld [vmem:[#allocation5 + $0x12c] ss:$16 sps:$4 sm:$0xff]   ;;  %v3045_v48 = vld [vmem:[#allocation5 + $0x544] ss:$16 sps:$4 sm:$0xff]  }
  0x79   :  { %1499 = vmatpush1.bf16.msra.mxu1 %v2953_v49  ;;  %v3048_v49 = vld [vmem:[#allocation5 + $0x14c] ss:$16 sps:$4 sm:$0xff]  }
  0x7a   :  { %1540 = vmatpush1.bf16.msra.mxu0 %v2954_v50  ;;  %1500 = vmatprep.subr.bf16.mxu1 %v2955_v52  ;;  %v3043_v50 = vld [vmem:[#allocation5 + $0x540] ss:$16 sps:$4 sm:$0xff]   ;;  %v3046_v52 = vld [vmem:[#allocation5 + $0x148] ss:$16 sps:$4 sm:$0xff]  }
  0x7b   :  { %1541 = vmatprep.subr.bf16.mxu0 %v2957_v53  ;;  %v3051_v53 = vld [vmem:[#allocation5 + $0x564] ss:$16 sps:$4 sm:$0xff]  }
  0x7d   :  { %1501 = vmatpush1.bf16.msra.mxu1 %v2959_v54  ;;  %v3054_v54 = vld [vmem:[#allocation5 + $0x16c] ss:$16 sps:$4 sm:$0xff]  }
  0x7e   :  { %1542 = vmatpush1.bf16.msra.mxu0 %v2960_v55  ;;  %1502 = vmatprep.subr.bf16.mxu1 %v2961_v56  ;;  %v3049_v55 = vld [vmem:[#allocation5 + $0x560] ss:$16 sps:$4 sm:$0xff]   ;;  %v3052_v56 = vld [vmem:[#allocation5 + $0x168] ss:$16 sps:$4 sm:$0xff]  }
  0x7f   :  { %1543 = vmatprep.subr.bf16.mxu0 %v2963_v57  ;;  %v3057_v57 = vld [vmem:[#allocation5 + $0x584] ss:$16 sps:$4 sm:$0xff]  }
  0x81   :  { %1503 = vmatpush1.bf16.msra.mxu1 %v2965_v58  ;;  %v3060_v58 = vld [vmem:[#allocation5 + $0x18c] ss:$16 sps:$4 sm:$0xff]  }
  0x82   :  { %1544 = vmatpush1.bf16.msra.mxu0 %v2966_v59  ;;  %1504 = vmatprep.subr.bf16.mxu1 %v2967_v60  ;;  %v3055_v59 = vld [vmem:[#allocation5 + $0x580] ss:$16 sps:$4 sm:$0xff]   ;;  %v3058_v60 = vld [vmem:[#allocation5 + $0x188] ss:$16 sps:$4 sm:$0xff]  }
  0x83   :  { %1545 = vmatprep.subr.bf16.mxu0 %v2969_v61  ;;  %v3063_v61 = vld [vmem:[#allocation5 + $0x5a4] ss:$16 sps:$4 sm:$0xff]  }
  0x85   :  { %1505 = vmatpush1.bf16.msra.mxu1 %v2971_v62  ;;  %v3066_v62 = vld [vmem:[#allocation5 + $0x1ac] ss:$16 sps:$4 sm:$0xff]  }
  0x86   :  { %1546 = vmatpush1.bf16.msra.mxu0 %v2972_v63  ;;  %1506 = vmatprep.subr.bf16.mxu1 %v2973_v0  ;;  %v3061_v63 = vld [vmem:[#allocation5 + $0x5a0] ss:$16 sps:$4 sm:$0xff]   ;;  %v3064_v0 = vld [vmem:[#allocation5 + $0x1a8] ss:$16 sps:$4 sm:$0xff]  }
  0x87   :  { %1547 = vmatprep.subr.bf16.mxu0 %v2975_v1  ;;  %v3069_v1 = vld [vmem:[#allocation5 + $0x5c4] ss:$16 sps:$4 sm:$0xff]  }
  0x89   :  { %1507 = vmatpush1.bf16.msra.mxu1 %v2977_v2  ;;  %v3072_v2 = vld [vmem:[#allocation5 + $0x1cc] ss:$16 sps:$4 sm:$0xff]  }
  0x8a   :  { %1548 = vmatpush1.bf16.msra.mxu0 %v2978_v3  ;;  %1640 = vmatprep.subr.bf16.mxu1 %v2988_v5  ;;  %v3067_v3 = vld [vmem:[#allocation5 + $0x5c0] ss:$16 sps:$4 sm:$0xff]   ;;  %v3075_v5 = vld [vmem:[#allocation5 + $0x5e4] ss:$16 sps:$4 sm:$0xff]  }
  0x8b   :  { %1558 = vmatprep.subr.bf16.mxu0 %v2985_v4  ;;  %v3070_v4 = vld [vmem:[#allocation5 + $0x1c8] ss:$16 sps:$4 sm:$0xff]  }
  0x8c   :  { %1509 = vmatmul.mubr.bf16.vlgmr.msra.gmra.mrb[0].mxu1 %v3566_v6 }
  0x8d   :  { %1550 = vmatmul.mubr.bf16.vlgmr.msra.gmra.mrb[0].mxu0 %v3568_v7  ;;  %1641 = vmatpush1.bf16.msra.mxu1 %v2986_v9  ;;  %v3073_v9 = vld [vmem:[#allocation5 + $0x5e0] ss:$16 sps:$4 sm:$0xff]  }
  0x8e   :  { %1559 = vmatpush1.bf16.msra.mxu0 %v2983_v8  ;;  %1642 = vmatprep.subr.bf16.mxu1 %v2994_v11  ;;  %v3078_v8 = vld [vmem:[#allocation5 + $0x1ec] ss:$16 sps:$4 sm:$0xff]   ;;  %v3083_v11 = vld [vmem:[#allocation5 + $0x604] ss:$16 sps:$4 sm:$0xff]  }
  0x8f   :  { %1560 = vmatprep.subr.bf16.mxu0 %v2991_v10  ;;  %1672 = vmatprep.mubr.bf16.mxu1 %v3560_v47  ;;  %v3040_v47 = vld [vmem:[#allocation5 + $0x128] ss:$16 sps:$4 sm:$0xff]  }
  0x90   :  { %1590 = vmatprep.mubr.bf16.mxu0 %v3577_v34  ;;  %v3076_v10 = vld [vmem:[#allocation5 + $0x1e8] ss:$16 sps:$4 sm:$0xff]  }
  0x91   :  { %1643 = vmatpush1.bf16.msra.mxu1 %v2992_v13  ;;  %v3582_v13 = vcombine.low %v3573_v32, %v3573_v32  ;;  %v3116_v32 = vld [vmem:[#allocation5 + $0x2ac] ss:$16 sps:$4 sm:$0xff]  }
  0x92   :  { %1561 = vmatpush1.bf16.msra.mxu0 %v2989_v12  ;;  %1644 = vmatprep.subr.bf16.mxu1 %v3000_v15  ;;  %v3086_v12 = vld [vmem:[#allocation5 + $0x20c] ss:$16 sps:$4 sm:$0xff]   ;;  %v3084_v15 = vld [vmem:[#allocation5 + $0x208] ss:$16 sps:$4 sm:$0xff]  }
  0x93   :  { %1562 = vmatprep.subr.bf16.mxu0 %v2997_v14  ;;  %v3081_v14 = vld [vmem:[#allocation5 + $0x600] ss:$16 sps:$4 sm:$0xff]  }
  0x95   :  { %1645 = vmatpush1.bf16.msra.mxu1 %v2998_v17  ;;  %v3092_v17 = vld [vmem:[#allocation5 + $0x22c] ss:$16 sps:$4 sm:$0xff]  }
  0x96   :  { %1563 = vmatpush1.bf16.msra.mxu0 %v2995_v16  ;;  %1646 = vmatprep.subr.bf16.mxu1 %v3006_v19  ;;  %v3089_v16 = vld [vmem:[#allocation5 + $0x624] ss:$16 sps:$4 sm:$0xff]   ;;  %v3090_v19 = vld [vmem:[#allocation5 + $0x228] ss:$16 sps:$4 sm:$0xff]  }
  0x97   :  { %1564 = vmatprep.subr.bf16.mxu0 %v3003_v18  ;;  %v3087_v18 = vld [vmem:[#allocation5 + $0x620] ss:$16 sps:$4 sm:$0xff]  }
  0x99   :  { %1647 = vmatpush1.bf16.msra.mxu1 %v3004_v21  ;;  %v3098_v21 = vld [vmem:[#allocation5 + $0x24c] ss:$16 sps:$4 sm:$0xff]  }
  0x9a   :  { %1565 = vmatpush1.bf16.msra.mxu0 %v3001_v20  ;;  %1648 = vmatprep.subr.bf16.mxu1 %v3012_v23  ;;  %v3095_v20 = vld [vmem:[#allocation5 + $0x644] ss:$16 sps:$4 sm:$0xff]   ;;  %v3093_v23 = vld [vmem:[#allocation5 + $0x640] ss:$16 sps:$4 sm:$0xff]  }
  0x9b   :  { %1566 = vmatprep.subr.bf16.mxu0 %v3009_v22  ;;  %v3470_v22 = vmov 0  }
  0x9d   :  { %1649 = vmatpush1.bf16.msra.mxu1 %v3010_v25  ;;  %v3104_v25 = vld [vmem:[#allocation5 + $0x26c] ss:$16 sps:$4 sm:$0xff]  }
  0x9e   :  { %1567 = vmatpush1.bf16.msra.mxu0 %v3007_v24  ;;  %1650 = vmatprep.subr.bf16.mxu1 %v3018_v27  ;;  %v3096_v24 = vld [vmem:[#allocation5 + $0x248] ss:$16 sps:$4 sm:$0xff]  }
  0x9f   :  { %1568 = vmatprep.subr.bf16.mxu0 %v3015_v26  ;;  %v3099_v26 = vld [vmem:[#allocation5 + $0x660] ss:$16 sps:$4 sm:$0xff]   ;;  %v3102_v27 = vld [vmem:[#allocation5 + $0x268] ss:$16 sps:$4 sm:$0xff]  }
  0xa1   :  { %1651 = vmatpush1.bf16.msra.mxu1 %v3016_v29  ;;  %v3110_v29 = vld [vmem:[#allocation5 + $0x28c] ss:$16 sps:$4 sm:$0xff]  }
  0xa2   :  { %1569 = vmatpush1.bf16.msra.mxu0 %v3013_v28  ;;  %1652 = vmatprep.subr.bf16.mxu1 %v3024_v31  ;;  %v3107_v28 = vld [vmem:[#allocation5 + $0x684] ss:$16 sps:$4 sm:$0xff]  }
  0xa3   :  { %1570 = vmatprep.subr.bf16.mxu0 %v3021_v30  ;;  %v3105_v30 = vld [vmem:[#allocation5 + $0x680] ss:$16 sps:$4 sm:$0xff]   ;;  %v3113_v31 = vld [vmem:[#allocation5 + $0x6a4] ss:$16 sps:$4 sm:$0xff]  }
  0xa5   :  { %1653 = vmatpush1.bf16.msra.mxu1 %v3022_v35  ;;  %v3114_v35 = vld [vmem:[#allocation5 + $0x2a8] ss:$16 sps:$4 sm:$0xff]  }
  0xa6   :  { %1571 = vmatpush1.bf16.msra.mxu0 %v3019_v33  ;;  %1654 = vmatprep.subr.bf16.mxu1 %v3030_v37  ;;  %v3111_v33 = vld [vmem:[#allocation5 + $0x6a0] ss:$16 sps:$4 sm:$0xff]   ;;  %v3122_v37 = vld [vmem:[#allocation5 + $0x2cc] ss:$16 sps:$4 sm:$0xff]  }
  0xa7   :  { %1572 = vmatprep.subr.bf16.mxu0 %v3027_v36  ;;  %v3119_v36 = vld [vmem:[#allocation5 + $0x6c4] ss:$16 sps:$4 sm:$0xff]  }
  0xa9   :  { %1655 = vmatpush1.bf16.msra.mxu1 %v3028_v39  ;;  %v3120_v39 = vld [vmem:[#allocation5 + $0x2c8] ss:$16 sps:$4 sm:$0xff]  }
  0xaa   :  { %1573 = vmatpush1.bf16.msra.mxu0 %v3025_v38  ;;  %1656 = vmatprep.subr.bf16.mxu1 %v3036_v41  ;;  %v3117_v38 = vld [vmem:[#allocation5 + $0x6c0] ss:$16 sps:$4 sm:$0xff]   ;;  %v3128_v41 = vld [vmem:[#allocation5 + $0x2ec] ss:$16 sps:$4 sm:$0xff]  }
  0xab   :  { %1574 = vmatprep.subr.bf16.mxu0 %v3033_v40  ;;  %v3125_v40 = vld [vmem:[#allocation5 + $0x6e4] ss:$16 sps:$4 sm:$0xff]  }
  0xad   :  { %1657 = vmatpush1.bf16.msra.mxu1 %v3034_v43  ;;  %v3126_v43 = vld [vmem:[#allocation5 + $0x2e8] ss:$16 sps:$4 sm:$0xff]  }
  0xae   :  { %1575 = vmatpush1.bf16.msra.mxu0 %v3031_v42  ;;  %1658 = vmatprep.subr.bf16.mxu1 %v3042_v45  ;;  %v3123_v42 = vld [vmem:[#allocation5 + $0x6e0] ss:$16 sps:$4 sm:$0xff]   ;;  %v3588_v45 = vld [vmem:[#allocation2 + $0x18] ss:$0 sps:$4 sm:$0xff]  }
  0xaf   :  { %1576 = vmatprep.subr.bf16.mxu0 %v3039_v44  ;;  %v3132_v44 = vld [vmem:[#allocation5 + $0x30c] ss:$16 sps:$4 sm:$0xff]  }
  0xb1   :  { %1659 = vmatpush1.bf16.msra.mxu1 %v3040_v47  ;;  %v3135_v47 = vld [vmem:[#allocation5 + $0x32c] ss:$16 sps:$4 sm:$0xff]  }
  0xb2   :  { %1577 = vmatpush1.bf16.msra.mxu0 %v3037_v46  ;;  %1660 = vmatprep.subr.bf16.mxu1 %v3048_v49  ;;  %v3130_v46 = vld [vmem:[#allocation5 + $0x308] ss:$16 sps:$4 sm:$0xff]   ;;  %v3228_v49 = vld [vmem:[#allocation7 + $0x4] ss:$8 sps:$4 sm:$0xff]  }
  0xb3   :  { %1578 = vmatprep.subr.bf16.mxu0 %v3045_v48  ;;  %v3226_v48 = vld [vmem:[#allocation7] ss:$8 sps:$4 sm:$0xff]  }
  0xb5   :  { %1661 = vmatpush1.bf16.msra.mxu1 %v3046_v52  ;;  %v3231_v52 = vld [vmem:[#allocation7 + $0x14] ss:$8 sps:$4 sm:$0xff]  }
  0xb6   :  { %1579 = vmatpush1.bf16.msra.mxu0 %v3043_v50  ;;  %1662 = vmatprep.subr.bf16.mxu1 %v3054_v54  ;;  %v3133_v50 = vld [vmem:[#allocation5 + $0x328] ss:$16 sps:$4 sm:$0xff]  }
  0xb7   :  { %1580 = vmatprep.subr.bf16.mxu0 %v3051_v53  ;;  %v3138_v53 = vld [vmem:[#allocation5 + $0x34c] ss:$16 sps:$4 sm:$0xff]   ;;  %v3229_v54 = vld [vmem:[#allocation7 + $0x10] ss:$8 sps:$4 sm:$0xff]  }
  0xb9   :  { %1663 = vmatpush1.bf16.msra.mxu1 %v3052_v56  ;;  %v3136_v56 = vld [vmem:[#allocation5 + $0x348] ss:$16 sps:$4 sm:$0xff]  }
  0xba   :  { %1581 = vmatpush1.bf16.msra.mxu0 %v3049_v55  ;;  %1664 = vmatprep.subr.bf16.mxu1 %v3060_v58  ;;  %v3234_v55 = vld [vmem:[#allocation7 + $0x24] ss:$8 sps:$4 sm:$0xff]   ;;  %v3232_v58 = vld [vmem:[#allocation7 + $0x20] ss:$8 sps:$4 sm:$0xff]  }
  0xbb   :  { %1582 = vmatprep.subr.bf16.mxu0 %v3057_v57  ;;  %v3141_v57 = vld [vmem:[#allocation5 + $0x36c] ss:$16 sps:$4 sm:$0xff]  }
  0xbd   :  { %1665 = vmatpush1.bf16.msra.mxu1 %v3058_v60  ;;  %v3144_v60 = vld [vmem:[#allocation5 + $0x38c] ss:$16 sps:$4 sm:$0xff]  }
  0xbe   :  { %1583 = vmatpush1.bf16.msra.mxu0 %v3055_v59  ;;  %1666 = vmatprep.subr.bf16.mxu1 %v3066_v62  ;;  %v3139_v59 = vld [vmem:[#allocation5 + $0x368] ss:$16 sps:$4 sm:$0xff]  }
  0xbf   :  { %1584 = vmatprep.subr.bf16.mxu0 %v3063_v61  ;;  %v3237_v61 = vld [vmem:[#allocation7 + $0x34] ss:$8 sps:$4 sm:$0xff]   ;;  %v3235_v62 = vld [vmem:[#allocation7 + $0x30] ss:$8 sps:$4 sm:$0xff]  }
  0xc1   :  { %1667 = vmatpush1.bf16.msra.mxu1 %v3064_v0  ;;  %v3142_v0 = vld [vmem:[#allocation5 + $0x388] ss:$16 sps:$4 sm:$0xff]  }
  0xc2   :  { %1585 = vmatpush1.bf16.msra.mxu0 %v3061_v63  ;;  %1668 = vmatprep.subr.bf16.mxu1 %v3072_v2  ;;  %v3240_v63 = vld [vmem:[#allocation7 + $0x44] ss:$8 sps:$4 sm:$0xff]   ;;  %v3238_v2 = vld [vmem:[#allocation7 + $0x40] ss:$8 sps:$4 sm:$0xff]  }
  0xc3   :  { %1586 = vmatprep.subr.bf16.mxu0 %v3069_v1  ;;  %v3147_v1 = vld [vmem:[#allocation5 + $0x3ac] ss:$16 sps:$4 sm:$0xff]  }
  0xc5   :  { %1669 = vmatpush1.bf16.msra.mxu1 %v3070_v4  ;;  %v3145_v4 = vld [vmem:[#allocation5 + $0x3a8] ss:$16 sps:$4 sm:$0xff]  }
  0xc6   :  { %1587 = vmatpush1.bf16.msra.mxu0 %v3067_v3  ;;  %1670 = vmatprep.subr.bf16.mxu1 %v3078_v8  ;;  %v3243_v3 = vld [vmem:[#allocation7 + $0x54] ss:$8 sps:$4 sm:$0xff]   ;;  %v3241_v8 = vld [vmem:[#allocation7 + $0x50] ss:$8 sps:$4 sm:$0xff]  }
  0xc7   :  { %1588 = vmatprep.subr.bf16.mxu0 %v3075_v5  ;;  %v3150_v5 = vld [vmem:[#allocation5 + $0x3cc] ss:$16 sps:$4 sm:$0xff]  }
  0xc9   :  { %1671 = vmatpush1.bf16.msra.mxu1 %v3076_v10  ;;  %v3148_v10 = vld [vmem:[#allocation5 + $0x3c8] ss:$16 sps:$4 sm:$0xff]  }
  0xca   :  { %1589 = vmatpush1.bf16.msra.mxu0 %v3073_v9  ;;  %1681 = vmatprep.subr.bf16.mxu1 %v3086_v12  ;;  %v3246_v9 = vld [vmem:[#allocation7 + $0x64] ss:$8 sps:$4 sm:$0xff]   ;;  %v3244_v12 = vld [vmem:[#allocation7 + $0x60] ss:$8 sps:$4 sm:$0xff]  }
  0xcb   :  { %1599 = vmatprep.subr.bf16.mxu0 %v3083_v11  ;;  %v3153_v11 = vld [vmem:[#allocation5 + $0x3ec] ss:$16 sps:$4 sm:$0xff]  }
  0xcc   :  { %1673 = vmatmul.mubr.bf16.vlgmr.msra.gmra.mrb[4].mxu1 %v3566_v6  ;;  %v3101_v6 = vld [vmem:[#allocation5 + $0x664] ss:$16 sps:$4 sm:$0xff]  }
  0xcd   :  { %1591 = vmatmul.mubr.bf16.vlgmr.msra.gmra.mrb[0].mxu0 %v3582_v13  ;;  %1682 = vmatpush1.bf16.msra.mxu1 %v3084_v15  ;;  %v3151_v15 = vld [vmem:[#allocation5 + $0x3e8] ss:$16 sps:$4 sm:$0xff]  }
  0xce   :  { %1600 = vmatpush1.bf16.msra.mxu0 %v3081_v14  ;;  %1683 = vmatprep.subr.bf16.mxu1 %v3092_v17  ;;  %v3249_v14 = vld [vmem:[#allocation7 + $0x74] ss:$8 sps:$4 sm:$0xff]   ;;  %v3247_v17 = vld [vmem:[#allocation7 + $0x70] ss:$8 sps:$4 sm:$0xff]  }
  0xcf   :  { %1601 = vmatprep.subr.bf16.mxu0 %v3089_v16  ;;  %1631 = vmatprep.mubr.bf16.mxu0 %v3470_v22  ;;  %v3156_v16 = vld [vmem:[#allocation5 + $0x40c] ss:$16 sps:$4 sm:$0xff]  }
  0xd0   :  { %1713 = vmatprep.mubr.bf16.mxu1 %v3562_v51  ;;  %v3108_v51 = vld [vmem:[#allocation5 + $0x288] ss:$16 sps:$4 sm:$0xff]  }
  0xd1   :  { %1684 = vmatpush1.bf16.msra.mxu1 %v3090_v19  ;;  %v3154_v19 = vld [vmem:[#allocation5 + $0x408] ss:$16 sps:$4 sm:$0xff]  }
  0xd2   :  { %1602 = vmatpush1.bf16.msra.mxu0 %v3087_v18  ;;  %1685 = vmatprep.subr.bf16.mxu1 %v3098_v21  ;;  %v3252_v18 = vld [vmem:[#allocation7 + $0x84] ss:$8 sps:$4 sm:$0xff]   ;;  %v3250_v21 = vld [vmem:[#allocation7 + $0x80] ss:$8 sps:$4 sm:$0xff]  }
  0xd3   :  { %1603 = vmatprep.subr.bf16.mxu0 %v3095_v20  ;;  %v3159_v20 = vld [vmem:[#allocation5 + $0x42c] ss:$16 sps:$4 sm:$0xff]  }
  0xd5   :  { %1686 = vmatpush1.bf16.msra.mxu1 %v3096_v24  ;;  %v3157_v24 = vld [vmem:[#allocation5 + $0x428] ss:$16 sps:$4 sm:$0xff]  }
  0xd6   :  { %1604 = vmatpush1.bf16.msra.mxu0 %v3093_v23  ;;  %1687 = vmatprep.subr.bf16.mxu1 %v3104_v25  ;;  %v3255_v23 = vld [vmem:[#allocation7 + $0x94] ss:$8 sps:$4 sm:$0xff]   ;;  %v3253_v25 = vld [vmem:[#allocation7 + $0x90] ss:$8 sps:$4 sm:$0xff]  }
  0xd7   :  { %1605 = vmatprep.subr.bf16.mxu0 %v3101_v6  ;;  %v3162_v6 = vld [vmem:[#allocation5 + $0x44c] ss:$16 sps:$4 sm:$0xff]  }
  0xd9   :  { %1688 = vmatpush1.bf16.msra.mxu1 %v3102_v27  ;;  %v3160_v27 = vld [vmem:[#allocation5 + $0x448] ss:$16 sps:$4 sm:$0xff]  }
  0xda   :  { %1606 = vmatpush1.bf16.msra.mxu0 %v3099_v26  ;;  %1689 = vmatprep.subr.bf16.mxu1 %v3110_v29  ;;  %v3258_v26 = vld [vmem:[#allocation7 + $0xa4] ss:$8 sps:$4 sm:$0xff]   ;;  %v3256_v29 = vld [vmem:[#allocation7 + $0xa0] ss:$8 sps:$4 sm:$0xff]  }
  0xdb   :  { %1607 = vmatprep.subr.bf16.mxu0 %v3107_v28  ;;  %v3165_v28 = vld [vmem:[#allocation5 + $0x46c] ss:$16 sps:$4 sm:$0xff]  }
  0xdd   :  { %1690 = vmatpush1.bf16.msra.mxu1 %v3108_v51  ;;  %v3168_v51 = vld [vmem:[#allocation5 + $0x48c] ss:$16 sps:$4 sm:$0xff]  }
  0xde   :  { %1608 = vmatpush1.bf16.msra.mxu0 %v3105_v30  ;;  %1691 = vmatprep.subr.bf16.mxu1 %v3116_v32  ;;  %v3163_v30 = vld [vmem:[#allocation5 + $0x468] ss:$16 sps:$4 sm:$0xff]  }
  0xdf   :  { %1609 = vmatprep.subr.bf16.mxu0 %v3113_v31  ;;  %v3264_v31 = vld [vmem:[#allocation7 + $0xc4] ss:$8 sps:$4 sm:$0xff]   ;;  %v3166_v32 = vld [vmem:[#allocation5 + $0x488] ss:$16 sps:$4 sm:$0xff]  }
  0xe1   :  { %1692 = vmatpush1.bf16.msra.mxu1 %v3114_v35  ;;  %v3262_v35 = vld [vmem:[#allocation7 + $0xc0] ss:$8 sps:$4 sm:$0xff]  }
  0xe2   :  { %1610 = vmatpush1.bf16.msra.mxu0 %v3111_v33  ;;  %1693 = vmatprep.subr.bf16.mxu1 %v3122_v37  ;;  %v3171_v33 = vld [vmem:[#allocation5 + $0x4ac] ss:$16 sps:$4 sm:$0xff]   ;;  %v3169_v37 = vld [vmem:[#allocation5 + $0x4a8] ss:$16 sps:$4 sm:$0xff]  }
  0xe3   :  { %1611 = vmatprep.subr.bf16.mxu0 %v3119_v36  ;;  %v3267_v36 = vld [vmem:[#allocation7 + $0xd4] ss:$8 sps:$4 sm:$0xff]  }
  0xe5   :  { %1694 = vmatpush1.bf16.msra.mxu1 %v3120_v39  ;;  %v3265_v39 = vld [vmem:[#allocation7 + $0xd0] ss:$8 sps:$4 sm:$0xff]  }
  0xe6   :  { %1612 = vmatpush1.bf16.msra.mxu0 %v3117_v38  ;;  %1695 = vmatprep.subr.bf16.mxu1 %v3128_v41  ;;  %v3174_v38 = vld [vmem:[#allocation5 + $0x4cc] ss:$16 sps:$4 sm:$0xff]  }
  0xe7   :  { %1613 = vmatprep.subr.bf16.mxu0 %v3125_v40  ;;  %v3172_v40 = vld [vmem:[#allocation5 + $0x4c8] ss:$16 sps:$4 sm:$0xff]   ;;  %v3177_v41 = vld [vmem:[#allocation5 + $0x4ec] ss:$16 sps:$4 sm:$0xff]  }
  0xe9   :  { %1696 = vmatpush1.bf16.msra.mxu1 %v3126_v43  ;;  %v3180_v43 = vld [vmem:[#allocation5 + $0x50c] ss:$16 sps:$4 sm:$0xff]  }
  0xea   :  { %1614 = vmatpush1.bf16.msra.mxu0 %v3123_v42  ;;  %1697 = vmatprep.subr.bf16.mxu1 %v3132_v44  ;;  %v3175_v42 = vld [vmem:[#allocation5 + $0x4e8] ss:$16 sps:$4 sm:$0xff]  }
  0xeb   :  { %2216 = vmatprep.subr.bf16.mxu0 %v3228_v49  ;;  %v3178_v44 = vld [vmem:[#allocation5 + $0x508] ss:$16 sps:$4 sm:$0xff]  }
  0xec   :  { %v3184_v49 = vld [vmem:[#allocation5 + $0x548] ss:$16 sps:$4 sm:$0xff]  }
  0xed   :  { %1632 = vmatmul.mubr.bf16.vlgmr.msra.gmra.mrb[0].mxu0 %v3588_v45  ;;  %1698 = vmatpush1.bf16.msra.mxu1 %v3130_v46  ;;  %v3183_v46 = vld [vmem:[#allocation5 + $0x52c] ss:$16 sps:$4 sm:$0xff]  }
  0xee   :  { %1699 = vmatprep.subr.bf16.mxu1 %v3135_v47  ;;  %2217 = vmatpush1.bf16.msra.mxu0 %v3226_v48  ;;  %v3181_v47 = vld [vmem:[#allocation5 + $0x528] ss:$16 sps:$4 sm:$0xff]   ;;  %v3186_v48 = vld [vmem:[#allocation5 + $0x54c] ss:$16 sps:$4 sm:$0xff]  }
  0xef   :  { %2218 = vmatprep.subr.bf16.mxu0 %v3231_v52  ;;  %v3187_v52 = vld [vmem:[#allocation5 + $0x568] ss:$16 sps:$4 sm:$0xff]  }
  0xf1   :  { %1700 = vmatpush1.bf16.msra.mxu1 %v3133_v50  ;;  %v3189_v50 = vld [vmem:[#allocation5 + $0x56c] ss:$16 sps:$4 sm:$0xff]  }
  0xf2   :  { %1701 = vmatprep.subr.bf16.mxu1 %v3138_v53  ;;  %2219 = vmatpush1.bf16.msra.mxu0 %v3229_v54  ;;  %v3192_v53 = vld [vmem:[#allocation5 + $0x58c] ss:$16 sps:$4 sm:$0xff]   ;;  %v3190_v54 = vld [vmem:[#allocation5 + $0x588] ss:$16 sps:$4 sm:$0xff]  }
  0xf3   :  { %2220 = vmatprep.subr.bf16.mxu0 %v3234_v55  ;;  %v3195_v55 = vld [vmem:[#allocation5 + $0x5ac] ss:$16 sps:$4 sm:$0xff]  }
  0xf5   :  { %1702 = vmatpush1.bf16.msra.mxu1 %v3136_v56  ;;  %v3193_v56 = vld [vmem:[#allocation5 + $0x5a8] ss:$16 sps:$4 sm:$0xff]  }
  0xf6   :  { %1703 = vmatprep.subr.bf16.mxu1 %v3141_v57  ;;  %2221 = vmatpush1.bf16.msra.mxu0 %v3232_v58  ;;  %v3198_v57 = vld [vmem:[#allocation5 + $0x5cc] ss:$16 sps:$4 sm:$0xff]  }
  0xf7   :  { %2222 = vmatprep.subr.bf16.mxu0 %v3237_v61  ;;  %v3270_v58 = vld [vmem:[#allocation7 + $0xe4] ss:$8 sps:$4 sm:$0xff]  }
  0xf8   :  { %v3201_v61 = vld [vmem:[#allocation5 + $0x5ec] ss:$16 sps:$4 sm:$0xff]  }
  0xf9   :  { %1704 = vmatpush1.bf16.msra.mxu1 %v3139_v59  ;;  %v3268_v59 = vld [vmem:[#allocation7 + $0xe0] ss:$8 sps:$4 sm:$0xff]  }
  0xfa   :  { %1705 = vmatprep.subr.bf16.mxu1 %v3144_v60  ;;  %2223 = vmatpush1.bf16.msra.mxu0 %v3235_v62  ;;  %v3196_v60 = vld [vmem:[#allocation5 + $0x5c8] ss:$16 sps:$4 sm:$0xff]   ;;  %v3273_v62 = vld [vmem:[#allocation7 + $0xf4] ss:$8 sps:$4 sm:$0xff]  }
  0xfb   :  { %2224 = vmatprep.subr.bf16.mxu0 %v3240_v63  ;;  %v3271_v63 = vld [vmem:[#allocation7 + $0xf0] ss:$8 sps:$4 sm:$0xff]  }
  0xfd   :  { %1706 = vmatpush1.bf16.msra.mxu1 %v3142_v0  ;;  %v3199_v0 = vld [vmem:[#allocation5 + $0x5e8] ss:$16 sps:$4 sm:$0xff]  }
  0xfe   :  { %1707 = vmatprep.subr.bf16.mxu1 %v3147_v1  ;;  %2225 = vmatpush1.bf16.msra.mxu0 %v3238_v2  ;;  %v3204_v1 = vld [vmem:[#allocation5 + $0x60c] ss:$16 sps:$4 sm:$0xff]   ;;  %v3202_v2 = vld [vmem:[#allocation5 + $0x608] ss:$16 sps:$4 sm:$0xff]  }
  0xff   :  { %2226 = vmatprep.subr.bf16.mxu0 %v3243_v3  ;;  %v3276_v3 = vld [vmem:[#allocation7 + $0x104] ss:$8 sps:$4 sm:$0xff]  }
 0x101   :  { %1708 = vmatpush1.bf16.msra.mxu1 %v3145_v4  ;;  %v3207_v4 = vld [vmem:[#allocation5 + $0x62c] ss:$16 sps:$4 sm:$0xff]  }
 0x102   :  { %1709 = vmatprep.subr.bf16.mxu1 %v3150_v5  ;;  %2227 = vmatpush1.bf16.msra.mxu0 %v3241_v8  ;;  %v3205_v5 = vld [vmem:[#allocation5 + $0x628] ss:$16 sps:$4 sm:$0xff]   ;;  %v3210_v8 = vld [vmem:[#allocation5 + $0x64c] ss:$16 sps:$4 sm:$0xff]  }
 0x103   :  { %2228 = vmatprep.subr.bf16.mxu0 %v3246_v9  ;;  %v3208_v9 = vld [vmem:[#allocation5 + $0x648] ss:$16 sps:$4 sm:$0xff]  }
 0x105   :  { %1710 = vmatpush1.bf16.msra.mxu1 %v3148_v10  ;;  %v3213_v10 = vld [vmem:[#allocation5 + $0x66c] ss:$16 sps:$4 sm:$0xff]  }
 0x106   :  { %1711 = vmatprep.subr.bf16.mxu1 %v3153_v11  ;;  %2229 = vmatpush1.bf16.msra.mxu0 %v3244_v12  ;;  %v3211_v11 = vld [vmem:[#allocation5 + $0x668] ss:$16 sps:$4 sm:$0xff]   ;;  %v3216_v12 = vld [vmem:[#allocation5 + $0x68c] ss:$16 sps:$4 sm:$0xff]  }
 0x107   :  { %2230 = vmatprep.subr.bf16.mxu0 %v3249_v14  ;;  %v3214_v14 = vld [vmem:[#allocation5 + $0x688] ss:$16 sps:$4 sm:$0xff]  }
 0x109   :  { %1712 = vmatpush1.bf16.msra.mxu1 %v3151_v15  ;;  %v3219_v15 = vld [vmem:[#allocation5 + $0x6ac] ss:$16 sps:$4 sm:$0xff]  }
 0x10a   :  { %1722 = vmatprep.subr.bf16.mxu1 %v3156_v16  ;;  %2231 = vmatpush1.bf16.msra.mxu0 %v3247_v17  ;;  %v3222_v16 = vld [vmem:[#allocation5 + $0x6cc] ss:$16 sps:$4 sm:$0xff]  }
 0x10b   :  { %2232 = vmatprep.subr.bf16.mxu0 %v3252_v18 }
 0x10c   :  { %1714 = vmatmul.mubr.bf16.vlgmr.msra.gmra.mrb[4].mxu1 %v3568_v7  ;;  %v3261_v7 = vld [vmem:[#allocation7 + $0xb4] ss:$8 sps:$4 sm:$0xff]  }
 0x10d   :  { %1723 = vmatpush1.bf16.msra.mxu1 %v3154_v19  ;;  %1754 = vmatprep.mubr.bf16.mxu1 %v3577_v34  ;;  %v3259_v34 = vld [vmem:[#allocation7 + $0xb0] ss:$8 sps:$4 sm:$0xff]  }
 0x10e   :  { %1724 = vmatprep.subr.bf16.mxu1 %v3159_v20  ;;  %2233 = vmatpush1.bf16.msra.mxu0 %v3250_v21  ;;  %v3220_v19 = vld [vmem:[#allocation5 + $0x6c8] ss:$16 sps:$4 sm:$0xff]   ;;  %v3225_v21 = vld [vmem:[#allocation5 + $0x6ec] ss:$16 sps:$4 sm:$0xff]  }
 0x10f   :  { %2234 = vmatprep.subr.bf16.mxu0 %v3255_v23  ;;  %v3223_v23 = vld [vmem:[#allocation5 + $0x6e8] ss:$16 sps:$4 sm:$0xff]  }
 0x111   :  { %1725 = vmatpush1.bf16.msra.mxu1 %v3157_v24  ;;  %v311_v24 = vlaneseq }
 0x112   :  { %1726 = vmatprep.subr.bf16.mxu1 %v3162_v6  ;;  %2235 = vmatpush1.bf16.msra.mxu0 %v3253_v25 }
 0x113   :  { %2236 = vmatprep.subr.bf16.mxu0 %v3258_v26  ;;  %v3596_v6 = vshrl.u32 %v311_v24, 7  ;;  %v3602_v26 = vld [vmem:[%s3639_s2] sm:$0xf] }
 0x115   :  { %1727 = vmatpush1.bf16.msra.mxu1 %v3160_v27  ;;  %v313_v25 = vsub.s32 0, %v3596_v6  ;;  %v317_v27 = vsub.s32 1, %v3596_v6  ;;  %v321_v24 = vsub.s32 2, %v3596_v6 }
 0x116   :  { %1728 = vmatprep.subr.bf16.mxu1 %v3165_v28  ;;  %2237 = vmatpush1.bf16.msra.mxu0 %v3256_v29 }
 0x117   :  { %2238 = vmatprep.subr.bf16.mxu0 %v3261_v7  ;;  %v314_v28 = vrot.slane %v3602_v26, %v313_v25 }
 0x119   :  { %1729 = vmatpush1.bf16.msra.mxu1 %v3163_v30 }
 0x11a   :  { %1730 = vmatprep.subr.bf16.mxu1 %v3168_v51  ;;  %2239 = vmatpush1.bf16.msra.mxu0 %v3259_v34 }
 0x11b   :  { %2240 = vmatprep.subr.bf16.mxu0 %v3264_v31 }
 0x11d   :  { %1731 = vmatpush1.bf16.msra.mxu1 %v3166_v32 }
 0x11e   :  { %1732 = vmatprep.subr.bf16.mxu1 %v3171_v33  ;;  %2241 = vmatpush1.bf16.msra.mxu0 %v3262_v35 }
 0x11f   :  { %2242 = vmatprep.subr.bf16.mxu0 %v3267_v36 }
 0x121   :  { %1733 = vmatpush1.bf16.msra.mxu1 %v3169_v37 }
 0x122   :  { %1734 = vmatprep.subr.bf16.mxu1 %v3174_v38  ;;  %2243 = vmatpush1.bf16.msra.mxu0 %v3265_v39 }
 0x123   :  { %2244 = vmatprep.subr.bf16.mxu0 %v3270_v58  ;;  %v3329_v58 = vld [vmem:[#allocation8 + $0x18] sm:$0xff]  }
 0x125   :  { %1735 = vmatpush1.bf16.msra.mxu1 %v3172_v40  ;;  %v3274_v40 = vld [vmem:[#allocation7 + $0x100] ss:$8 sps:$4 sm:$0xff]  }
 0x126   :  { %1736 = vmatprep.subr.bf16.mxu1 %v3177_v41  ;;  %2245 = vmatpush1.bf16.msra.mxu0 %v3268_v59  ;;  %v3330_v59 = vld [vmem:[#allocation8 + $0x60] sm:$0xff]  }
 0x127   :  { %2246 = vmatprep.subr.bf16.mxu0 %v3273_v62  ;;  %v3331_v62 = vld [vmem:[#allocation8 + $0x20] sm:$0xff]  }
 0x129   :  { %1737 = vmatpush1.bf16.msra.mxu1 %v3175_v42  ;;  %v3279_v42 = vld [vmem:[#allocation7 + $0x114] ss:$8 sps:$4 sm:$0xff]  }
 0x12a   :  { %1738 = vmatprep.subr.bf16.mxu1 %v3180_v43  ;;  %2247 = vmatpush1.bf16.msra.mxu0 %v3271_v63  ;;  %v3322_v43 = vld [vmem:[#allocation8 + $0x40] sm:$0xff]   ;;  %v3332_v63 = vld [vmem:[#allocation8 + $0x68] sm:$0xff]  }
 0x12b   :  { %2257 = vmatprep.subr.bf16.mxu0 %v3276_v3  ;;  %v3292_v3 = vld [vmem:[#allocation7 + $0x160] ss:$8 sps:$4 sm:$0xff]  }
 0x12d   :  { %1739 = vmatpush1.bf16.msra.mxu1 %v3178_v44  ;;  %v3323_v44 = vld [vmem:[#allocation8] sm:$0xff]  }
 0x12e   :  { %1740 = vmatprep.subr.bf16.mxu1 %v3183_v46  ;;  %v3324_v46 = vld [vmem:[#allocation8 + $0x48] sm:$0xff]  }
 0x131   :  { %1741 = vmatpush1.bf16.msra.mxu1 %v3181_v47  ;;  %v3277_v47 = vld [vmem:[#allocation7 + $0x110] ss:$8 sps:$4 sm:$0xff]  }
 0x132   :  { %1742 = vmatprep.subr.bf16.mxu1 %v3186_v48  ;;  %v3282_v48 = vld [vmem:[#allocation7 + $0x124] ss:$8 sps:$4 sm:$0xff]  }
 0x135   :  { %1743 = vmatpush1.bf16.msra.mxu1 %v3184_v49  ;;  %v3325_v49 = vld [vmem:[#allocation8 + $0x8] sm:$0xff]  }
 0x136   :  { %1744 = vmatprep.subr.bf16.mxu1 %v3189_v50  ;;  %v3326_v50 = vld [vmem:[#allocation8 + $0x50] sm:$0xff]  }
 0x139   :  { %1745 = vmatpush1.bf16.msra.mxu1 %v3187_v52  ;;  %v3280_v52 = vld [vmem:[#allocation7 + $0x120] ss:$8 sps:$4 sm:$0xff]  }
 0x13a   :  { %1746 = vmatprep.subr.bf16.mxu1 %v3192_v53  ;;  %v3285_v53 = vld [vmem:[#allocation7 + $0x134] ss:$8 sps:$4 sm:$0xff]  }
 0x13d   :  { %1747 = vmatpush1.bf16.msra.mxu1 %v3190_v54  ;;  %v3327_v54 = vld [vmem:[#allocation8 + $0x10] sm:$0xff]  }
 0x13e   :  { %1748 = vmatprep.subr.bf16.mxu1 %v3195_v55  ;;  %v3328_v55 = vld [vmem:[#allocation8 + $0x58] sm:$0xff]  }
 0x141   :  { %1749 = vmatpush1.bf16.msra.mxu1 %v3193_v56  ;;  %v3283_v56 = vld [vmem:[#allocation7 + $0x130] ss:$8 sps:$4 sm:$0xff]  }
 0x142   :  { %1750 = vmatprep.subr.bf16.mxu1 %v3198_v57  ;;  %v3288_v57 = vld [vmem:[#allocation7 + $0x144] ss:$8 sps:$4 sm:$0xff]  }
 0x145   :  { %1751 = vmatpush1.bf16.msra.mxu1 %v3196_v60  ;;  %v3286_v60 = vld [vmem:[#allocation7 + $0x140] ss:$8 sps:$4 sm:$0xff]  }
 0x146   :  { %1752 = vmatprep.subr.bf16.mxu1 %v3201_v61  ;;  %v3291_v61 = vld [vmem:[#allocation7 + $0x154] ss:$8 sps:$4 sm:$0xff]  }
 0x149   :  { %1753 = vmatpush1.bf16.msra.mxu1 %v3199_v0  ;;  %v3289_v0 = vld [vmem:[#allocation7 + $0x150] ss:$8 sps:$4 sm:$0xff]  }
 0x14a   :  { %1763 = vmatprep.subr.bf16.mxu1 %v3204_v1  ;;  %v3294_v1 = vld [vmem:[#allocation7 + $0x164] ss:$8 sps:$4 sm:$0xff]  }
 0x14c   :  { %1755 = vmatmul.mubr.bf16.vlgmr.msra.gmra.mrb[4].mxu1 %v3582_v13  ;;  %v3217_v13 = vld [vmem:[#allocation5 + $0x6a8] ss:$16 sps:$4 sm:$0xff]  }
 0x14d   :  { %1764 = vmatpush1.bf16.msra.mxu1 %v3202_v2  ;;  %1795 = vmatprep.mubr.bf16.mxu1 %v3470_v22  ;;  %v3333_v2 = vld [vmem:[#allocation8 + $0x28] sm:$0xff]  }
 0x14e   :  { %1765 = vmatprep.subr.bf16.mxu1 %v3207_v4  ;;  %v3297_v4 = vld [vmem:[#allocation7 + $0x174] ss:$8 sps:$4 sm:$0xff]  }
 0x151   :  { %1766 = vmatpush1.bf16.msra.mxu1 %v3205_v5  ;;  %v3295_v5 = vld [vmem:[#allocation7 + $0x170] ss:$8 sps:$4 sm:$0xff]  }
 0x152   :  { %1767 = vmatprep.subr.bf16.mxu1 %v3210_v8  ;;  %v3300_v8 = vld [vmem:[#allocation7 + $0x184] ss:$8 sps:$4 sm:$0xff]  }
 0x155   :  { %1768 = vmatpush1.bf16.msra.mxu1 %v3208_v9  ;;  %v3298_v9 = vld [vmem:[#allocation7 + $0x180] ss:$8 sps:$4 sm:$0xff]  }
 0x156   :  { %1769 = vmatprep.subr.bf16.mxu1 %v3213_v10  ;;  %v3303_v10 = vld [vmem:[#allocation7 + $0x194] ss:$8 sps:$4 sm:$0xff]  }
 0x159   :  { %1770 = vmatpush1.bf16.msra.mxu1 %v3211_v11  ;;  %v3301_v11 = vld [vmem:[#allocation7 + $0x190] ss:$8 sps:$4 sm:$0xff]  }
 0x15a   :  { %1771 = vmatprep.subr.bf16.mxu1 %v3216_v12  ;;  %v3306_v12 = vld [vmem:[#allocation7 + $0x1a4] ss:$8 sps:$4 sm:$0xff]  }
 0x15d   :  { %1772 = vmatpush1.bf16.msra.mxu1 %v3214_v14  ;;  %v3304_v14 = vld [vmem:[#allocation7 + $0x1a0] ss:$8 sps:$4 sm:$0xff]  }
 0x15e   :  { %1773 = vmatprep.subr.bf16.mxu1 %v3219_v15  ;;  %v3309_v15 = vld [vmem:[#allocation7 + $0x1b4] ss:$8 sps:$4 sm:$0xff]  }
 0x15f   :  { %v1510_v17 = vpop.f32.mrb[0].mxu1 }
 0x160   :  { %v1512_v22 = vpop.f32.mrb[1].mxu1  ;;  %v1511_v29 = vadd.f32 %v1510_v17, %v314_v28  ;;  %v3310_v17 = vld [vmem:[#allocation7 + $0x1c0] ss:$8 sps:$4 sm:$0xff]   ;;  %v325_v28 = vsub.s32 3, %v3596_v6  ;;  %v2800_v6 = vld [vmem:[%s3643_s6] ss:$0 sm:$0xff] }
 0x161   :  { %v1514_v18 = vpop.f32.mrb[2].mxu1  ;;  %1774 = vmatpush1.bf16.msra.mxu1 %v3217_v13  ;;  %v3307_v13 = vld [vmem:[#allocation7 + $0x1b0] ss:$8 sps:$4 sm:$0xff]  }
 0x162   :  { %v1515_v20 = vpop.f32.mrb[3].mxu1  ;;  %1775 = vmatprep.subr.bf16.mxu1 %v3222_v16  ;;  %v3312_v16 = vld [vmem:[#allocation7 + $0x1c4] ss:$8 sps:$4 sm:$0xff]   ;;  %v3313_v18 = vld [vmem:[#allocation7 + $0x1d0] ss:$8 sps:$4 sm:$0xff]  }
 0x163   :  { %v3316_v20 = vld [vmem:[#allocation7 + $0x1e0] ss:$8 sps:$4 sm:$0xff]  }
 0x165   :  { %1776 = vmatpush1.bf16.msra.mxu1 %v3220_v19  ;;  %v3318_v19 = vld [vmem:[#allocation7 + $0x1e4] ss:$8 sps:$4 sm:$0xff]  }
 0x166   :  { %1777 = vmatprep.subr.bf16.mxu1 %v3225_v21  ;;  %v3321_v21 = vld [vmem:[#allocation7 + $0x1f4] ss:$8 sps:$4 sm:$0xff]  }
 0x169   :  { %1778 = vmatpush1.bf16.msra.mxu1 %v3223_v23  ;;  %v3319_v23 = vld [vmem:[#allocation7 + $0x1f0] ss:$8 sps:$4 sm:$0xff]  }
 0x16a   :  { %2817 = vmatprep.subr.bf16.mxu1 %v3322_v43  ;;  %v1884_v43 = vld [vmem:[%s3641_s4] sm:$0x3] }
 0x16c   :  { %1796 = vmatmul.mubr.bf16.vlgmr.msra.gmra.mrb[4].mxu1 %v3588_v45  ;;  %v318_v45 = vrot.slane %v3602_v26, %v317_v27 }
 0x16d   :  { %2818 = vmatpush3.bf16.msra.mxu1 %v3323_v44  ;;  %v1889_v44 = vrot.slane %v1884_v43, %v313_v25 }
 0x16e   :  { %v1513_v7 = vadd.f32 %v1512_v22, %v318_v45  ;;  %2819 = vmatprep.subr.bf16.mxu1 %v3324_v46  ;;  %v3315_v22 = vld [vmem:[#allocation7 + $0x1d4] ss:$8 sps:$4 sm:$0xff]   ;;  %v322_v45 = vrot.slane %v3602_v26, %v321_v24  ;;  %v1893_v46 = vrot.slane %v1884_v43, %v317_v27 }
 0x171   :  { %2820 = vmatpush3.bf16.msra.mxu1 %v3325_v49 }
 0x172   :  { %2821 = vmatprep.subr.bf16.mxu1 %v3326_v50 }
 0x175   :  { %2822 = vmatpush3.bf16.msra.mxu1 %v3327_v54 }
 0x176   :  { %2823 = vmatprep.subr.bf16.mxu1 %v3328_v55 }
 0x179   :  { %2824 = vmatpush3.bf16.msra.mxu1 %v3329_v58 }
 0x17a   :  { %2825 = vmatprep.subr.bf16.mxu1 %v3330_v59 }
 0x17d   :  { %2826 = vmatpush3.bf16.msra.mxu1 %v3331_v62 }
 0x17e   :  { %2827 = vmatprep.subr.bf16.mxu1 %v3332_v63 }
 0x181   :  { %2828 = vmatpush3.bf16.msra.mxu1 %v3333_v2 }
 0x1c0   :  { %v1633_v30 = vpop.f32.mrb[0].mxu0 }
 0x1c1   :  { %v2840_v51 = vadd.f32 %v1633_v30, %v1511_v29  ;;  %v1635_v34 = vpop.f32.mrb[1].mxu0  ;;  %v326_v29 = vrot.slane %v3602_v26, %v325_v28  ;;  %v3336_v26 = vld [vmem:[#allocation8 + $0x78] sm:$0xff]  }
 0x1c2   :  { %v2842_v31 = vadd.f32 %v1635_v34, %v1513_v7  ;;  %v1637_v32 = vpop.f32.mrb[2].mxu0 }
 0x1c3   :  { %vm1804_vm0 = vcmp.gt.f32.partialorder %v2840_v51, 0.0  ;;  %v1808_v33 = vmul.f32 0.01, %v2840_v51  ;;  %v1638_v35 = vpop.f32.mrb[3].mxu0 }
 0x1c4   :  { %vm1805_vm1 = vcmp.gt.f32.partialorder %v2842_v31, 0.0  ;;  %v1809_v36 = vmul.f32 0.01, %v2842_v31 }
 0x1c5   :  { %v1812_v37 = vsel %vm1804_vm0, %v2840_v51, %v1808_v33 }
 0x1c6   :  { %v1813_v38 = vsel %vm1805_vm1, %v2842_v31, %v1809_v36  ;;  %v1816_v41 = vpack.c.bf16 %v1812_v37, %v1812_v37 }
 0x1c7   :  { %v1817_v39 = vpack.c.bf16 %v1813_v38, %v1813_v38 }
 0x1c9   :  { %2248 = vmatprep.mubr.bf16.mxu0 %v1817_v39 }
 0x1ca   :  { %2249 = vmatmul.mubr.bf16.vlgmr.msra.gmra.mrb[4].mxu0 %v1816_v41  ;;  %v3335_v41 = vld [vmem:[#allocation8 + $0x30] sm:$0xff]  }
 0x1cb   :  { %2258 = vmatpush1.bf16.msra.mxu0 %v3274_v40  ;;  %v3334_v40 = vld [vmem:[#allocation8 + $0x70] sm:$0xff]  }
 0x1cc   :  { %2259 = vmatprep.subr.bf16.mxu0 %v3279_v42  ;;  %2829 = vmatprep.subr.bf16.mxu1 %v3334_v40  ;;  %v3337_v42 = vld [vmem:[#allocation8 + $0x38] sm:$0xff]  }
 0x1cd   :  { %2830 = vmatpush3.bf16.msra.mxu1 %v3335_v41 }
 0x1ce   :  { %2831 = vmatprep.subr.bf16.mxu1 %v3336_v26 }
 0x1cf   :  { %2260 = vmatpush1.bf16.msra.mxu0 %v3277_v47 }
 0x1d0   :  { %2261 = vmatprep.subr.bf16.mxu0 %v3282_v48 }
 0x1d1   :  { %2832 = vmatpush3.bf16.msra.mxu1 %v3337_v42 }
 0x1d3   :  { %2262 = vmatpush1.bf16.msra.mxu0 %v3280_v52 }
 0x1d4   :  { %2263 = vmatprep.subr.bf16.mxu0 %v3285_v53 }
 0x1d7   :  { %2264 = vmatpush1.bf16.msra.mxu0 %v3283_v56 }
 0x1d8   :  { %2265 = vmatprep.subr.bf16.mxu0 %v3288_v57 }
 0x1db   :  { %2266 = vmatpush1.bf16.msra.mxu0 %v3286_v60 }
 0x1dc   :  { %2267 = vmatprep.subr.bf16.mxu0 %v3291_v61 }
 0x1df   :  { %2268 = vmatpush1.bf16.msra.mxu0 %v3289_v0 }
 0x1e0   :  { %2269 = vmatprep.subr.bf16.mxu0 %v3294_v1 }
 0x1e3   :  { %2270 = vmatpush1.bf16.msra.mxu0 %v3292_v3 }
 0x1e4   :  { %2271 = vmatprep.subr.bf16.mxu0 %v3297_v4 }
 0x1e7   :  { %2272 = vmatpush1.bf16.msra.mxu0 %v3295_v5 }
 0x1e8   :  { %2273 = vmatprep.subr.bf16.mxu0 %v3300_v8 }
 0x1eb   :  { %2274 = vmatpush1.bf16.msra.mxu0 %v3298_v9 }
 0x1ec   :  { %2275 = vmatprep.subr.bf16.mxu0 %v3303_v10 }
 0x1ef   :  { %2276 = vmatpush1.bf16.msra.mxu0 %v3301_v11 }
 0x1f0   :  { %2277 = vmatprep.subr.bf16.mxu0 %v3306_v12 }
 0x1f3   :  { %2278 = vmatpush1.bf16.msra.mxu0 %v3304_v14 }
 0x1f4   :  { %2279 = vmatprep.subr.bf16.mxu0 %v3309_v15 }
 0x1f7   :  { %2280 = vmatpush1.bf16.msra.mxu0 %v3307_v13 }
 0x1f8   :  { %2281 = vmatprep.subr.bf16.mxu0 %v3312_v16 }
 0x1fb   :  { %2282 = vmatpush1.bf16.msra.mxu0 %v3310_v17 }
 0x1fc   :  { %2283 = vmatprep.subr.bf16.mxu0 %v3315_v22 }
 0x1ff   :  { %2284 = vmatpush1.bf16.msra.mxu0 %v3313_v18 }
 0x200   :  { %2285 = vmatprep.subr.bf16.mxu0 %v3318_v19 }
 0x203   :  { %2286 = vmatpush1.bf16.msra.mxu0 %v3316_v20 }
 0x204   :  { %2287 = vmatprep.subr.bf16.mxu0 %v3321_v21 }
 0x207   :  { %2288 = vmatpush1.bf16.msra.mxu0 %v3319_v23 }
 0x23f   :  { %v1797_v7 = vpop.f32.mrb[4].mxu1 }
 0x240   :  { %v2843_v30 = vadd.f32 %v1797_v7, %v322_v45  ;;  %v1799_v51 = vpop.f32.mrb[5].mxu1 }
 0x241   :  { %v2844_v34 = vadd.f32 %v1799_v51, %v326_v29  ;;  %v1801_v31 = vpop.f32.mrb[6].mxu1 }
 0x242   :  { %vm1806_vm2 = vcmp.gt.f32.partialorder %v2843_v30, 0.0  ;;  %v1810_v32 = vmul.f32 0.01, %v2843_v30  ;;  %v1802_v33 = vpop.f32.mrb[7].mxu1 }
 0x243   :  { %vm1807_vm3 = vcmp.gt.f32.partialorder %v2844_v34, 0.0  ;;  %v1811_v35 = vmul.f32 0.01, %v2844_v34 }
 0x244   :  { %v1814_v36 = vsel %vm1806_vm2, %v2843_v30, %v1810_v32 }
 0x245   :  { %v1815_v37 = vsel %vm1807_vm3, %v2844_v34, %v1811_v35  ;;  %v1818_v39 = vpack.c.bf16 %v1814_v36, %v1814_v36 }
 0x246   :  { %v1819_v38 = vpack.c.bf16 %v1815_v37, %v1815_v37 }
 0x248   :  { %2289 = vmatprep.mubr.bf16.mxu0 %v1819_v38 }
 0x249   :  { %2290 = vmatmul.mubr.bf16.vlgmr.msra.gmra.mrb[4].mxu0 %v1818_v39 }
 0x31c   :  { %v2291_v47 = vpop.f32.mrb[4].mxu0 }
 0x31d   :  { %v2845_v48 = vadd.f32 %v2291_v47, %v1889_v44  ;;  %v2293_v49 = vpop.f32.mrb[5].mxu0 }
 0x31e   :  { %v2846_v50 = vadd.f32 %v2293_v49, %v1893_v46  ;;  %v2295_v52 = vpop.f32.mrb[6].mxu0 }
 0x31f   :  { %vm2298_vm4 = vcmp.gt.f32.partialorder %v2845_v48, 0.0  ;;  %v2300_v53 = vmul.f32 0.01, %v2845_v48  ;;  %v2296_v54 = vpop.f32.mrb[7].mxu0 }
 0x320   :  { %vm2299_vm5 = vcmp.gt.f32.partialorder %v2846_v50, 0.0  ;;  %v2301_v55 = vmul.f32 0.01, %v2846_v50 }
 0x321   :  { %v2302_v56 = vsel %vm2298_vm4, %v2845_v48, %v2300_v53 }
 0x322   :  { %v2303_v57 = vsel %vm2299_vm5, %v2846_v50, %v2301_v55  ;;  %v2304_v59 = vpack.c.bf16 %v2302_v56, %v2302_v56 }
 0x323   :  { %v2305_v58 = vpack.c.bf16 %v2303_v57, %v2303_v57 }
 0x325   :  { %2473 = vmatprep.mubr.bf16.mxu1 %v2305_v58 }
 0x326   :  { %2474 = vmatmul.mubr.bf16.vlgmr.msra.gmra.mrb[8].mxu1 %v2304_v59 }
 0x3f9   :  { %v2833_v25 = vpop.f32.mrb[8].mxu1 }
 0x3fa   :  { %v2834_v27 = vpop.f32.mrb[9].mxu1 }
 0x3fb   :  { %v2835_v60 = vadd.f32 %v2834_v27, %v2833_v25  ;;  %v2836_v61 = vpop.f32.mrb[10].mxu1 }
 0x3fc   :  { %v2837_v62 = vpop.f32.mrb[11].mxu1 }
 0x3fd   :  { %v2476_v63 = vadd.f32 %v2835_v60, %v2800_v6 }
 0x3ff   :  { %v2481_v0 = vsub.f32 0.0, %v2476_v63 }
 0x401   :  { %v2482_v1 = vmul.f32 1.442695, %v2481_v0 }
 0x403   :  { %3338 = vpow2.f32 %v2482_v1 }
 0x40d   :  { %v3339_v2 = vpop.eup %3338 }
 0x40e   :  { %v2484_v3 = vadd.f32 1.0, %v3339_v2 }
 0x410   :  { %3340 = vrcp.f32 %v2484_v3 }
 0x41a   :  { %v3341_v4 = vpop.eup %3340 }
 0x41b   :  { %2487 = vst [vmem:[#allocation10] sm:$0xff] %v3341_v4 }
 0x41c   :  { %3441 = shalt.err (!%p3438_p8)
}
 0x41d   :  { %s3442_s12 = scalar_lea.hbm %s3644_s7, 128 }
 0x41e   :  { %p3443_p9 = scmp.ne.s32.totalorder %s3644_s7, %s3442_s12  ;;  %p3446_p10 = scmp.lt.u32.totalorder %s3442_s12, %s3644_s7 }
 0x420   :  { %p3448_p11 = pnand %p3446_p10, %p3443_p9 }
 0x422   :  { %3451 = shalt.err (!%p3448_p11)
}
 0x423   :  { %2497 = dma.vmem_to_hbm [thread:$0]  %s2495_s9, 128, %s3644_s7, [#allocation4]  }
 0x424   :  { %3458 = dma.done.wait [#allocation4], 128  }
 0x425   :  { %3459 = vsyncadd [#allocation4], 4294967168 }
 0x426   :  { %2501 = vsyncpa [#allocation3], 1 }
 0x427   :  { %2502 = vsyncpa [#allocation6], 1 }
 0x428   :  { %2503 = vsyncpa [#allocation9], 1 }
 0x429   :  { %2504 = vsyncpa [#allocation4], 1 }

</bundles_post_ra>
